<compile_context>
chip_gen: v5e
topology: v5e:2x2
jax: 0.10.0
libtpu: 0.0.40
codegen_flags: <defaults>
</compile_context>

<pallas_src>
import jax
import jax.numpy as jnp
import numpy as np
from jax.experimental import pallas as pl
from jax.experimental.pallas import tpu as pltpu

EPS = 1e-12                               # std clamp (speechbrain ASP eps)
BN_EPS = 1e-5                             # BatchNorm1d eps
BN_SCALE = 1.0 / np.sqrt(1.0 + BN_EPS)    # eval-mode BN with running mean=0, var=1, gamma=1, beta=0


def _asp_kernel(x_ref, w1x_ref, w1g_ref, b1_ref, w2_ref, out_ref):
    # x_ref : (BT, C, L) f32  (PyTorch NCL layout; relayout for the MXU done in-kernel)
    # w1x   : (C, A) bf16 (BN folded) ; w1g : (2C, A) bf16 ; b1 : (1, A) f32 ; w2 : (A, C) bf16
    # out_ref: (1, BT, 2C) f32  -- lane-dense [mean | std]
    x = x_ref[...]                                         # (BT, C, L) f32, single load
    BT, C, L = x.shape
    inv_L = 1.0 / L

    # --- global context statistics over time (sum / sum-of-squares form, f32 accumulation) ---
    sum_x = jnp.sum(x, axis=2)                             # (BT, C)
    sum_x2 = jnp.sum(x * x, axis=2)                        # (BT, C)
    mean_g = sum_x * inv_L
    std_g = jnp.sqrt(jnp.maximum(sum_x2 * inv_L - mean_g * mean_g, EPS))

    # --- relayout for the MXU: (BT, C, L) -> (BT, L, C), then bf16 for the matmul operands ---
    x_lc = jnp.transpose(x, (0, 2, 1))                     # XLU transpose (idle slot)
    x_bf_lc = x_lc.astype(jnp.bfloat16)                    # (BT, L, C) bf16

    # --- TDNN block: 1x1 conv over concat([x, mean_g, std_g]), batch folded into M ---
    h2 = jnp.dot(x_bf_lc.reshape(BT * L, C), w1x_ref[...],
                 preferred_element_type=jnp.float32)                       # (BT*L, A)
    g = jnp.concatenate([mean_g, std_g], axis=1).astype(jnp.bfloat16)      # (BT, 2C)
    const = jnp.dot(g, w1g_ref[...],
                    preferred_element_type=jnp.float32) + b1_ref[...]      # (BT, A)
    A = h2.shape[1]
    # ReLU -> eval BN (scale folded into w1/b1) -> tanh, in bf16 (bf16 EUP/VPU on v6e/v7x)
    h = (h2.reshape(BT, L, A) + const[:, None, :]).astype(jnp.bfloat16)
    h = jnp.tanh(jnp.maximum(h, 0.0))                                      # (BT, L, A) bf16

    # --- attention logits: second 1x1 conv (bias dropped: softmax over time cancels it) ---
    logits = jnp.dot(h.reshape(BT * L, A), w2_ref[...],
                     preferred_element_type=jnp.float32).reshape(BT, L, C)

    # --- softmax over time (axis 1), f32 ---
    m = jnp.max(logits, axis=1, keepdims=True)
    e = jnp.exp(logits - m)
    attn = e * pl.reciprocal(jnp.sum(e, axis=1, keepdims=True), approx=True)

    # --- attentive statistics on the f32 NCL block (no extra f32 copy of x held) ---
    attn_cl = jnp.transpose(attn, (0, 2, 1))               # (BT, C, L), XLU
    ax = attn_cl * x                                       # attn * x
    mean = jnp.sum(ax, axis=2)                             # (BT, C)
    m2 = jnp.sum(ax * x, axis=2)                           # sum(attn * x^2)
    std = jnp.sqrt(jnp.maximum(m2 - mean * mean, EPS))     # (BT, C)

    # single lane-dense store of the concatenated [mean | std] slab
    out_ref[...] = jnp.concatenate([mean, std], axis=1)[None, :, :].astype(out_ref.dtype)


def attentive_stat_pool_1d(x_ncl, kernel_params, dim_to_reduce=2, batch_tile=None):
    """x_ncl: (B, C, L) PyTorch-layout input (f32). Returns (B, 2*embedding_size)."""
    if dim_to_reduce == 2:
        x = x_ncl                                    # pool over dim 2 (time = L)
    elif dim_to_reduce == 1:
        x = jnp.transpose(x_ncl, (0, 2, 1))          # pooling layer sees tensor.transpose(1, 2)
    else:
        raise ValueError("can only pool dimension 1 or 2")

    B, C, L = x.shape
    w1x, w1g, b1, w2 = kernel_params
    A = w1x.shape[1]
    assert w1x.shape[0] == C, (w1x.shape, C)

    # --- lane-pad channels to a multiple of 128 (no-op for lane-aligned C) ---
    C_pad = C if C % 128 == 0 else ((C + 127) // 128) * 128
    if C_pad != C:
        x = jnp.pad(x, ((0, 0), (0, C_pad - C), (0, 0)))
        w1x = jnp.pad(w1x, ((0, C_pad - C), (0, 0)))
        w1g_pad = jnp.zeros((2 * C_pad, A), dtype=w1g.dtype)
        w1g_pad = w1g_pad.at[:C, :].set(w1g[:C])
        w1g_pad = w1g_pad.at[C_pad:C_pad + C, :].set(w1g[C:])
        w1g = w1g_pad
        w2 = jnp.pad(w2, ((0, 0), (0, C_pad - C)))

    # --- VMEM budget from real device capacity (v7x has only 64 MiB per core) ---
    try:
        vmem_cap = int(pltpu.get_tpu_info().vmem_capacity_bytes)
    except Exception:
        vmem_cap = 64 << 20                      # conservative fallback (v7x per-core VMEM)
    budget = vmem_cap - (16 << 20)               # headroom for compiler scratch

    w_bytes = (w1x.size + w1g.size + w2.size) * 2 + b1.size * 4

    def need_bytes(bt):
        x_blk = bt * C_pad * L * 4                         # f32 NCL input block (double-buffered)
        out_blk = bt * 2 * C_pad * 4
        # conservative in-kernel temporaries: several (BT,L,C) f32 passes + (BT,L,A) activations
        tmp = bt * L * (14 * C_pad + 6 * A)
        return 2 * x_blk + 2 * out_blk + 2 * w_bytes + tmp + (2 << 20)

    # --- batch-tile selection: fill MXU M (~512 rows), keep >=2 grid steps, fit VMEM ---
    if batch_tile is None:
        bt = max(1, 512 // max(L, 1))
        bt = min(bt, max(1, B // 2))             # >=2 grid steps so v7x megacore uses both TCs
        bt = max(1, min(bt, B))
        while bt > 1 and need_bytes(bt) > budget:
            bt -= 1
    else:
        bt = max(1, int(batch_tile))
    # TODO(synk): if need_bytes(1) > budget (very long L), switch to an L-tiled online-softmax
    # variant (inner "arbitrary" grid axis over time with running max/denominator/moment scratch).

    grid_b = pl.cdiv(B, bt)
    B_pad = grid_b * bt
    if B_pad != B:
        x = jnp.pad(x, ((0, B_pad - B), (0, 0), (0, 0)))   # zero rows are numerically safe

    vmem_limit = int(min(max(need_bytes(bt), 32 << 20), vmem_cap - (4 << 20)))
    # TODO(synk): once pipeline_mode=pl.Buffered(1) is reliable for pallas_call auto-pipelining,
    # single-buffer the grid-invariant weight operands to reclaim their second VMEM buffer.

    out = pl.pallas_call(
        _asp_kernel,
        out_shape=jax.ShapeDtypeStruct((grid_b, bt, 2 * C_pad), jnp.float32),
        grid_spec=pltpu.PrefetchScalarGridSpec(
            num_scalar_prefetch=0,
            grid=(grid_b,),
            in_specs=[
                pl.BlockSpec((bt, C_pad, L), lambda b: (b, 0, 0)),   # x, f32 NCL
                pl.BlockSpec((C_pad, A), lambda b: (0, 0)),          # w1x (bf16, BN folded)
                pl.BlockSpec((2 * C_pad, A), lambda b: (0, 0)),      # w1 for [mean_g, std_g]
                pl.BlockSpec((1, A), lambda b: (0, 0)),              # b1 (f32, BN folded)
                pl.BlockSpec((A, C_pad), lambda b: (0, 0)),          # w2 (bf16)
            ],
            out_specs=pl.BlockSpec((1, bt, 2 * C_pad), lambda b: (b, 0, 0)),
        ),
        compiler_params=pltpu.CompilerParams(
            dimension_semantics=("parallel",),
            vmem_limit_bytes=vmem_limit,
        ),
    )(x, w1x, w1g, b1, w2)

    out = out.reshape(B_pad, 2 * C_pad)[:B]                # free row-major reshape + row slice
    if C_pad != C:                                         # drop the padded channels
        out = jnp.concatenate([out[:, :C], out[:, C_pad:C_pad + C]], axis=1)
    # PyTorch: .squeeze() then re-add batch dim if it vanished -> always (B, 2C) here.
    return out


def make_params(embedding_size, attention_channels, key):
    """Deterministic synthetic weights for the two 1x1 convs (TDNN + attention conv)."""
    C, A = embedding_size, attention_channels
    k1, k2, k3, k4 = jax.random.split(key, 4)
    # Conv1d(3C -> A, k=1): torch weight (A, 3C); stored transposed and split by source.
    w1 = 0.1 * jax.random.normal(k1, (3 * C, A), jnp.float32)
    b1 = 0.1 * jax.random.normal(k2, (1, A), jnp.float32)
    # Conv1d(A -> C, k=1)
    w2 = 0.1 * jax.random.normal(k3, (A, C), jnp.float32)
    b2 = 0.1 * jax.random.normal(k4, (1, C), jnp.float32)

    # Fold the eval-mode BatchNorm scale into conv1 (relu(s*z) == s*relu(z) for s > 0).
    # TODO(synk): real checkpoints need gamma/beta/running BN stats folded here as well.
    w1_f = w1 * BN_SCALE
    b1_f = b1 * BN_SCALE
    w1x = w1_f[0:C].astype(jnp.bfloat16)            # acts on x              (C, A)
    w1g = w1_f[C:3 * C].astype(jnp.bfloat16)        # acts on [mean_g,std_g] (2C, A)
    # b2 is NOT passed to the kernel: the softmax over time cancels it exactly.
    kernel_params = (w1x, w1g, b1_f, w2.astype(jnp.bfloat16))
    raw_params = (w1, b1, w2, b2)                   # f32 originals (incl. b2) for the reference
    return kernel_params, raw_params


def reference(x_ncl, w1, b1, w2, b2):
    """Pure-JAX f32 reference of the same forward pass (for correctness check)."""
    x = x_ncl.astype(jnp.float32)                              # (B, C, L)
    mean_g = jnp.mean(x, axis=2, keepdims=True)
    std_g = jnp.sqrt(jnp.maximum(jnp.mean((x - mean_g) ** 2, axis=2, keepdims=True), EPS))
    attn_in = jnp.concatenate(
        [x, jnp.broadcast_to(mean_g, x.shape), jnp.broadcast_to(std_g, x.shape)], axis=1)
    h = jnp.einsum("bil,ia->bal", attn_in, w1) + b1.T[None]    # (B, A, L)
    h = jnp.tanh(jnp.maximum(h, 0.0) * BN_SCALE)
    logits = jnp.einsum("bal,ac->bcl", h, w2) + b2.T[None]     # (B, C, L)  (b2 kept here)
    attn = jax.nn.softmax(logits, axis=2)
    mean = jnp.sum(attn * x, axis=2)
    std = jnp.sqrt(jnp.maximum(jnp.sum(attn * (x - mean[..., None]) ** 2, axis=2), EPS))
    return jnp.concatenate([mean, std], axis=1)                # (B, 2C)


if __name__ == "__main__":
    B, C, L = 2, 16, 16                # batch, embedding_size, time
    A = 128                            # attention_channels (speechbrain default)

    key = jax.random.PRNGKey(0)
    kx, kp = jax.random.split(key)
    x = jax.random.normal(kx, (B, C, L), jnp.float32)          # PyTorch NCL input

    kernel_params, raw_params = make_params(C, A, kp)

    out = attentive_stat_pool_1d(x, kernel_params, dim_to_reduce=2)
    out = jax.block_until_ready(out)

    ref = reference(x, *raw_params)
    assert out.shape == (B, 2 * C), out.shape
    # bf16 MXU operands / bf16 tanh + approx reciprocal -> compare against the f32 reference
    # with a bf16-appropriate tolerance.
    np.testing.assert_allclose(np.asarray(out), np.asarray(ref), rtol=2e-2, atol=2e-2)

    print("KERNEL_OK")
</pallas_src>

<mosaic_0001>
module attributes {stable_mosaic.version = 11 : i64} {
  func.func @_asp_kernel(%arg0: i32, %arg1: memref<1x128x16xf32, #tpu.memory_space<vmem>>, %arg2: memref<128x128xbf16, #tpu.memory_space<vmem>>, %arg3: memref<256x128xbf16, #tpu.memory_space<vmem>>, %arg4: memref<1x128xf32, #tpu.memory_space<vmem>>, %arg5: memref<128x128xbf16, #tpu.memory_space<vmem>>, %arg6: memref<1x1x256xf32, #tpu.memory_space<vmem>>) attributes {dimension_semantics = [#tpu.dimension_semantics<parallel>], iteration_bounds = array<i64: 2>, scalar_prefetch = 0 : i64, scratch_operands = 0 : i64, tpu.core_type = #tpu.core_type<tc>, window_params = [{transform_indices = @transform_0, window_bounds = array<i64: 1, 128, 16>}, {pipeline_mode = #tpu.pipeline_mode<synchronous>, transform_indices = @transform_1, window_bounds = array<i64: 128, 128>}, {pipeline_mode = #tpu.pipeline_mode<synchronous>, transform_indices = @transform_2, window_bounds = array<i64: 256, 128>}, {pipeline_mode = #tpu.pipeline_mode<synchronous>, transform_indices = @transform_3, window_bounds = array<i64: 1, 128>}, {pipeline_mode = #tpu.pipeline_mode<synchronous>, transform_indices = @transform_4, window_bounds = array<i64: 128, 128>}, {transform_indices = @transform_5, window_bounds = array<i64: 1, 1, 256>}]} {
    %c0 = arith.constant 0 : index
    %c0_0 = arith.constant 0 : index
    %c0_1 = arith.constant 0 : index
    %0 = vector.load %arg1[%c0, %c0_0, %c0_1] : memref<1x128x16xf32, #tpu.memory_space<vmem>>, vector<1x128x16xf32>
    %cst = arith.constant dense<0.000000e+00> : vector<1x128xf32>
    %1 = vector.multi_reduction <add>, %0, %cst [2] : vector<1x128x16xf32> to vector<1x128xf32>
    %2 = arith.mulf %0, %0 : vector<1x128x16xf32>
    %cst_2 = arith.constant dense<0.000000e+00> : vector<1x128xf32>
    %3 = vector.multi_reduction <add>, %2, %cst_2 [2] : vector<1x128x16xf32> to vector<1x128xf32>
    %cst_3 = arith.constant 6.250000e-02 : f32
    %4 = vector.broadcast %cst_3 : f32 to vector<1x128xf32>
    %5 = arith.mulf %1, %4 : vector<1x128xf32>
    %cst_4 = arith.constant 6.250000e-02 : f32
    %6 = vector.broadcast %cst_4 : f32 to vector<1x128xf32>
    %7 = arith.mulf %3, %6 : vector<1x128xf32>
    %8 = arith.mulf %5, %5 : vector<1x128xf32>
    %9 = arith.subf %7, %8 : vector<1x128xf32>
    %cst_5 = arith.constant 9.99999996E-13 : f32
    %10 = vector.broadcast %cst_5 : f32 to vector<1x128xf32>
    %11 = arith.maximumf %9, %10 : vector<1x128xf32>
    %12 = math.sqrt %11 : vector<1x128xf32>
    %13 = tpu.transpose %0, [0, 2, 1] : vector<1x128x16xf32> -> vector<1x16x128xf32>
    %14 = arith.truncf %13 : vector<1x16x128xf32> to vector<1x16x128xbf16>
    %15 = vector.shape_cast %14 : vector<1x16x128xbf16> to vector<16x128xbf16>
    %c0_6 = arith.constant 0 : index
    %c0_7 = arith.constant 0 : index
    %16 = vector.load %arg2[%c0_6, %c0_7] : memref<128x128xbf16, #tpu.memory_space<vmem>>, vector<128x128xbf16>
    %cst_8 = arith.constant dense<0.000000e+00> : vector<16x128xf32>
    %17 = tpu.matmul %15, %16, %cst_8 {dimension_numbers = #tpu.dot_dimension_numbers<[1], [0], [0], [1], [0, 0, 1, 1], [], []>} : vector<16x128xbf16>, vector<128x128xbf16>, vector<16x128xf32> -> vector<16x128xf32>
    %18 = tpu.concatenate %5, %12 in 1 : vector<1x128xf32>, vector<1x128xf32> -> vector<1x256xf32>
    %19 = arith.truncf %18 : vector<1x256xf32> to vector<1x256xbf16>
    %c0_9 = arith.constant 0 : index
    %c0_10 = arith.constant 0 : index
    %20 = vector.load %arg3[%c0_9, %c0_10] : memref<256x128xbf16, #tpu.memory_space<vmem>>, vector<256x128xbf16>
    %cst_11 = arith.constant dense<0.000000e+00> : vector<1x128xf32>
    %21 = tpu.matmul %19, %20, %cst_11 {dimension_numbers = #tpu.dot_dimension_numbers<[1], [0], [0], [1], [0, 0, 1, 1], [], []>} : vector<1x256xbf16>, vector<256x128xbf16>, vector<1x128xf32> -> vector<1x128xf32>
    %c0_12 = arith.constant 0 : index
    %c0_13 = arith.constant 0 : index
    %22 = vector.load %arg4[%c0_12, %c0_13] : memref<1x128xf32, #tpu.memory_space<vmem>>, vector<1x128xf32>
    %23 = arith.addf %21, %22 : vector<1x128xf32>
    %24 = vector.shape_cast %17 : vector<16x128xf32> to vector<1x16x128xf32>
    %25 = vector.shape_cast %23 : vector<1x128xf32> to vector<1x1x128xf32>
    %26 = vector.broadcast %25 : vector<1x1x128xf32> to vector<1x16x128xf32>
    %27 = arith.addf %24, %26 : vector<1x16x128xf32>
    %28 = arith.truncf %27 : vector<1x16x128xf32> to vector<1x16x128xbf16>
    %cst_14 = arith.constant 0.000000e+00 : bf16
    %29 = vector.broadcast %cst_14 : bf16 to vector<1x16x128xbf16>
    %30 = arith.maximumf %28, %29 : vector<1x16x128xbf16>
    %31 = math.tanh %30 : vector<1x16x128xbf16>
    %32 = vector.shape_cast %31 : vector<1x16x128xbf16> to vector<16x128xbf16>
    %c0_15 = arith.constant 0 : index
    %c0_16 = arith.constant 0 : index
    %33 = vector.load %arg5[%c0_15, %c0_16] : memref<128x128xbf16, #tpu.memory_space<vmem>>, vector<128x128xbf16>
    %cst_17 = arith.constant dense<0.000000e+00> : vector<16x128xf32>
    %34 = tpu.matmul %32, %33, %cst_17 {dimension_numbers = #tpu.dot_dimension_numbers<[1], [0], [0], [1], [0, 0, 1, 1], [], []>} : vector<16x128xbf16>, vector<128x128xbf16>, vector<16x128xf32> -> vector<16x128xf32>
    %35 = vector.shape_cast %34 : vector<16x128xf32> to vector<1x16x128xf32>
    %cst_18 = arith.constant dense<0xFF800000> : vector<1x128xf32>
    %36 = vector.multi_reduction <maximumf>, %35, %cst_18 [1] : vector<1x16x128xf32> to vector<1x128xf32>
    %37 = vector.shape_cast %36 : vector<1x128xf32> to vector<1x1x128xf32>
    %38 = vector.broadcast %37 : vector<1x1x128xf32> to vector<1x16x128xf32>
    %39 = arith.subf %35, %38 : vector<1x16x128xf32>
    %40 = math.exp %39 : vector<1x16x128xf32>
    %cst_19 = arith.constant dense<0.000000e+00> : vector<1x128xf32>
    %41 = vector.multi_reduction <add>, %40, %cst_19 [1] : vector<1x16x128xf32> to vector<1x128xf32>
    %42 = vector.shape_cast %41 : vector<1x128xf32> to vector<1x1x128xf32>
    %43 = tpu.reciprocal %42 {approx = true} : vector<1x1x128xf32> -> vector<1x1x128xf32>
    %44 = vector.broadcast %43 : vector<1x1x128xf32> to vector<1x16x128xf32>
    %45 = arith.mulf %40, %44 : vector<1x16x128xf32>
    %46 = tpu.transpose %45, [0, 2, 1] : vector<1x16x128xf32> -> vector<1x128x16xf32>
    %47 = arith.mulf %46, %0 : vector<1x128x16xf32>
    %cst_20 = arith.constant dense<0.000000e+00> : vector<1x128xf32>
    %48 = vector.multi_reduction <add>, %47, %cst_20 [2] : vector<1x128x16xf32> to vector<1x128xf32>
    %49 = arith.mulf %47, %0 : vector<1x128x16xf32>
    %cst_21 = arith.constant dense<0.000000e+00> : vector<1x128xf32>
    %50 = vector.multi_reduction <add>, %49, %cst_21 [2] : vector<1x128x16xf32> to vector<1x128xf32>
    %51 = arith.mulf %48, %48 : vector<1x128xf32>
    %52 = arith.subf %50, %51 : vector<1x128xf32>
    %cst_22 = arith.constant 9.99999996E-13 : f32
    %53 = vector.broadcast %cst_22 : f32 to vector<1x128xf32>
    %54 = arith.maximumf %52, %53 : vector<1x128xf32>
    %55 = math.sqrt %54 : vector<1x128xf32>
    %56 = tpu.concatenate %48, %55 in 1 : vector<1x128xf32>, vector<1x128xf32> -> vector<1x256xf32>
    %57 = vector.shape_cast %56 : vector<1x256xf32> to vector<1x1x256xf32>
    %c0_23 = arith.constant 0 : index
    %c0_24 = arith.constant 0 : index
    %c0_25 = arith.constant 0 : index
    %58 = vector.load %arg6[%c0_23, %c0_24, %c0_25] : memref<1x1x256xf32, #tpu.memory_space<vmem>>, vector<1x1x256xf32>
    tpu.vector_store %arg6[%c0_23, %c0_24, %c0_25], %57 {strides = array<i32>} : memref<1x1x256xf32, #tpu.memory_space<vmem>>, vector<1x1x256xf32>,
    return
  }
  func.func @transform_0(%arg0: i32) -> (i32, i32, i32) {
    %c0_i32 = arith.constant 0 : i32
    %c0_i32_0 = arith.constant 0 : i32
    %c0_i32_1 = arith.constant 0 : i32
    return %arg0, %c0_i32, %c0_i32_0 : i32, i32, i32
  }
  func.func @transform_1(%arg0: i32) -> (i32, i32) {
    %c0_i32 = arith.constant 0 : i32
    %c0_i32_0 = arith.constant 0 : i32
    %c0_i32_1 = arith.constant 0 : i32
    return %c0_i32, %c0_i32_0 : i32, i32
  }
  func.func @transform_2(%arg0: i32) -> (i32, i32) {
    %c0_i32 = arith.constant 0 : i32
    %c0_i32_0 = arith.constant 0 : i32
    %c0_i32_1 = arith.constant 0 : i32
    return %c0_i32, %c0_i32_0 : i32, i32
  }
  func.func @transform_3(%arg0: i32) -> (i32, i32) {
    %c0_i32 = arith.constant 0 : i32
    %c0_i32_0 = arith.constant 0 : i32
    %c0_i32_1 = arith.constant 0 : i32
    return %c0_i32, %c0_i32_0 : i32, i32
  }
  func.func @transform_4(%arg0: i32) -> (i32, i32) {
    %c0_i32 = arith.constant 0 : i32
    %c0_i32_0 = arith.constant 0 : i32
    %c0_i32_1 = arith.constant 0 : i32
    return %c0_i32, %c0_i32_0 : i32, i32
  }
  func.func @transform_5(%arg0: i32) -> (i32, i32, i32) {
    %c0_i32 = arith.constant 0 : i32
    %c0_i32_0 = arith.constant 0 : i32
    %c0_i32_1 = arith.constant 0 : i32
    return %arg0, %c0_i32, %c0_i32_0 : i32, i32, i32
  }
}

</mosaic_0001>

<bundles_post_ra>
// kernel: tpu_custom_call.1
= control target key start
LH: loop header
LB: loop body
LE: loop exit
PB: predicated region body
PF: predicated region fallthrough
CT: control target
= control target key end

     0   :  { %10 = vsyncpa [#allocation3], 0  ;;  %s3065_s0 = inlined_call_operand.vmem [shape: f32[2,128,16], index: 0, kind: input, shape index: {}]   ;;  %s3066_s1 = inlined_call_operand.vmem [shape: bf16[128,128], index: 1, kind: input, shape index: {}]   ;;  %s3067_s2 = inlined_call_operand.vmem [shape: bf16[256,128], index: 2, kind: input, shape index: {}]   ;;  %s3068_s3 = inlined_call_operand.vmem [shape: f32[1,128], index: 3, kind: input, shape index: {}]   ;;  %s3069_s4 = inlined_call_operand.vmem [shape: bf16[128,128], index: 4, kind: input, shape index: {}]   ;;  %s3070_s5 = inlined_call_operand.hbm [shape: f32[2,1,256], index: 5, kind: output, shape index: {}]  }
   0x1   :  { %12 = vsyncpa [#allocation3 + $0x1], 0  ;;  %s2125_s18 = smov 0   ;;  %s2127_s19 = smov 0  }
   0x2   :  { %s2129_s20 = smov 0   ;;  %s2131_s21 = smov 0  }
   0x3 LB: > { %s2146_s22 = sadd.s32 4294967295, %s2093_s21   ;;  %s1729_s23 = sadd.s32 4294967294, %s2093_s21   ;;  %s2093_s21 = sphi %s2131_s21, %s3132_s21   ;;  %s2089_s20 = sphi %s2129_s20, %s3131_s20   ;;  %s2085_s19 = sphi %s2127_s19, %s3130_s19   ;;  %s2081_s18 = sphi %s2125_s18, %s3129_s18  }
   0x4   : > { %s2150_s24 = sadd.s32 1, %s2093_s21   ;;  %s135_s25 = sadd.s32 1, %s2089_s20 }
   0x5   : > { %s132_s26 = ssub.s32 %s2093_s21, %s2150_s24  ;;  %p145_p0 = scmp.ne.s32.totalorder %s2089_s20, %s2085_s19 }
   0x6   : > { %p133_p1 = scmp.eq.s32.totalorder %s132_s26, 0  ;;  %p146_p2 = scmp.eq.s32.totalorder %s2146_s22, 1 }
   0x7   : > { %p151_p3 = scmp.ne.s32.totalorder %s2085_s19, %s2081_s18  ;;  %p152_p4 = scmp.eq.s32.totalorder %s1729_s23, 1 }
   0x8   : > { %s2161_s27 = scalar_select %p133_p1, %s2089_s20, %s135_s25  }
   0x9   : > { %p2163_p5 = por %p146_p2, %p145_p0  ;;  %p2167_p6 = por %p152_p4, %p151_p3 }
   0xa   : > { %p1732_p7 = scmp.ge.s32.totalorder %s2093_s21, 1  ;;  %p190_p8 = scmp.lt.s32.totalorder %s2093_s21, 3 }
   0xc   : > { %p191_p9 = pnand %p1732_p7, %p190_p8 }
   0xd   : > { %p218_p10 = scmp.lt.s32.totalorder (!%p191_p9), %s2146_s22, 1  ;;  %s1865_s17 = sshll.u32 (!%p191_p9), %s2146_s22, 1 }
   0xe   : > { %194 = sbr.rel (%p191_p9) target bundleno = 1202 (0x4b2), region = 40  ;;  %s1665_s26 = scalar_lea.hbm (!%p191_p9), %s3070_s5, %s1865_s17 }
   0xf   : > { %s2051_s13 = scalar_lea.hbm (!%p191_p9), %s3070_s5, 4 }
  0x13   : > { %s219_s30 = scalar_select %p218_p10, %s2146_s22, 1  ;;  %vm3071_vm0 = vcmask 130048   ;;  %vm3075_vm1 = vcmask 130112   ;;  %vm3078_vm2 = vcmask 195712   ;;  %vm3076_vm3 = vcmask 261312  }
  0x14   : > { %vm3077_vm4 = vcmask 326912   ;;  %vm779_vm5 = vcmask 392512   ;;  %vm783_vm6 = vcmask 458112   ;;  %vm787_vm12 = vcmask 523712  }
  0x15   : > { %s1868_s6 = sshll.u32 %s219_s30, 7  ;;  %vm3073_vm14 = vcmask 589312   ;;  %vm3074_vm15 = vcmask 654912  }
  0x16   : > { %s2178_s9 = scalar_lea.vmem %s3065_s0, %s1868_s6  ;;  %s1669_s6 = sshll.u32 %s1665_s26, 4  ;;  %s1670_s6 = int_to_ptr.hbm [resolvable:$true] %s1669_s6 }
  0x17   : > { %v2181_v0 = vld [vmem:[%s2178_s9 + $0x10] sm:$0xff]  ;;  %v2184_v1 = vld [vmem:[%s2178_s9] sm:$0xff]  ;;  %v2193_v5 = vld [vmem:[%s2178_s9 + $0x8] sm:$0xff]  ;;  %s2045_s8 = sshra.s32 %s1670_s6, 4  ;;  %s2046_s8 = int_to_ptr.hbm [resolvable:$true] %s2045_s8 }
  0x18   : > { %v246_v2 = vsel %vm3071_vm0, %v2181_v0, 0.0  ;;  %v240_v3 = vsel %vm3071_vm0, %v2184_v1, 0.0  ;;  %v288_v4 = vmul.f32 %v2184_v1, %v2184_v1  ;;  %v2197_v7 = vld [vmem:[%s2178_s9 + $0x18] sm:$0xff]  ;;  %v289_v8 = vmul.f32 %v2193_v5, %v2193_v5  ;;  %v2209_v13 = vld [vmem:[%s2178_s9 + $0x20] sm:$0xff]  ;;  %v2212_v14 = vld [vmem:[%s2178_s9 + $0x28] sm:$0xff]  ;;  %s2047_s10 = scalar_lea.hbm %s2046_s8, 2  ;;  %p2052_p0 = scmp.lt.s32.totalorder %s2046_s8, %s3070_s5 }
  0x19   : > { %247 = vadd.xlane.f32.xlu1 %v246_v2  ;;  %241 = vadd.xlane.f32.xlu0 %v240_v3  ;;  %v249_v9 = vsel %vm3071_vm0, %v2197_v7, 0.0  ;;  %v243_v10 = vsel %vm3071_vm0, %v2193_v5, 0.0  ;;  %v290_v12 = vmul.f32 %v2181_v0, %v2181_v0  ;;  %v252_v16 = vsel %vm3071_vm0, %v2209_v13, 0.0  ;;  %v2222_v19 = vld [vmem:[%s2178_s9 + $0x30] sm:$0xff]  ;;  %v2233_v25 = vld [vmem:[%s2178_s9 + $0x38] sm:$0xff]  ;;  %v2236_v26 = vld [vmem:[%s2178_s9 + $0x40] sm:$0xff]  ;;  %p2048_p11 = scmp.ne.s32.totalorder %s2046_s8, %s2047_s10  ;;  %p2053_p1 = scmp.lt.s32.totalorder %s2051_s13, %s2047_s10 }
  0x1a   : > { %v304_v6 = vsel %vm3071_vm0, %v288_v4, 0.0  ;;  %v307_v11 = vsel %vm3071_vm0, %v289_v8, 0.0  ;;  %v255_v17 = vsel %vm3071_vm0, %v2212_v14, 0.0  ;;  %v291_v18 = vmul.f32 %v2197_v7, %v2197_v7  ;;  %v2246_v31 = vld [vmem:[%s2178_s9 + $0x48] sm:$0xff]  ;;  %v2257_v37 = vld [vmem:[%s2178_s9 + $0x50] sm:$0xff]  ;;  %v2260_v38 = vld [vmem:[%s2178_s9 + $0x58] sm:$0xff] }
  0x1b   : > { %305 = vadd.xlane.f32.xlu2 %v304_v6  ;;  %v310_v15 = vsel %vm3071_vm0, %v290_v12, 0.0  ;;  %v292_v20 = vmul.f32 %v2209_v13, %v2209_v13  ;;  %v258_v21 = vsel %vm3071_vm0, %v2222_v19, 0.0  ;;  %v293_v24 = vmul.f32 %v2212_v14, %v2212_v14  ;;  %v2270_v43 = vld [vmem:[%s2178_s9 + $0x60] sm:$0xff]  ;;  %v2281_v49 = vld [vmem:[%s2178_s9 + $0x68] sm:$0xff]  ;;  %v2284_v50 = vld [vmem:[%s2178_s9 + $0x70] sm:$0xff]  ;;  %p2049_p12 = pnand %p2048_p11, %p2163_p5  ;;  %p2054_p2 = por %p2053_p1, %p2052_p0 }
  0x1c   : > { %v313_v22 = vsel %vm3071_vm0, %v291_v18, 0.0  ;;  %v261_v28 = vsel %vm3071_vm0, %v2233_v25, 0.0  ;;  %v264_v29 = vsel %vm3071_vm0, %v2236_v26, 0.0  ;;  %v294_v30 = vmul.f32 %v2222_v19, %v2222_v19  ;;  %v2294_v55 = vld [vmem:[%s2178_s9 + $0x78] sm:$0xff] }
  0x1d   : > { %v316_v23 = vsel %vm3071_vm0, %v292_v20, 0.0  ;;  %v319_v27 = vsel %vm3071_vm0, %v293_v24, 0.0  ;;  %v295_v32 = vmul.f32 %v2233_v25, %v2233_v25  ;;  %v267_v33 = vsel %vm3071_vm0, %v2246_v31, 0.0  ;;  %p2050_p13 = pneg %p2049_p12 }
  0x1e   : > { %v322_v34 = vsel %vm3071_vm0, %v294_v30, 0.0  ;;  %v296_v36 = vmul.f32 %v2236_v26, %v2236_v26  ;;  %v270_v40 = vsel %vm3071_vm0, %v2257_v37, 0.0  ;;  %v273_v41 = vsel %vm3071_vm0, %v2260_v38, 0.0 }
  0x1f   : > { %v325_v35 = vsel %vm3071_vm0, %v295_v32, 0.0  ;;  %v297_v42 = vmul.f32 %v2246_v31, %v2246_v31  ;;  %v298_v44 = vmul.f32 %v2257_v37, %v2257_v37  ;;  %v276_v45 = vsel %vm3071_vm0, %v2270_v43, 0.0  ;;  %p2055_p3 = pnand %p2054_p2, %p2050_p13 }
  0x20   : > { %v328_v39 = vsel %vm3071_vm0, %v296_v36, 0.0  ;;  %v299_v48 = vmul.f32 %v2260_v38, %v2260_v38  ;;  %v279_v52 = vsel %vm3071_vm0, %v2281_v49, 0.0  ;;  %v282_v53 = vsel %vm3071_vm0, %v2284_v50, 0.0 }
  0x21   : > { %250 = vadd.xlane.f32.xlu1 %v249_v9  ;;  %244 = vadd.xlane.f32.xlu0 %v243_v10  ;;  %v331_v46 = vsel %vm3071_vm0, %v297_v42, 0.0  ;;  %v334_v47 = vsel %vm3071_vm0, %v298_v44, 0.0  ;;  %v300_v54 = vmul.f32 %v2270_v43, %v2270_v43  ;;  %v301_v56 = vmul.f32 %v2281_v49, %v2281_v49 }
  0x22   : > { %v337_v51 = vsel %vm3071_vm0, %v299_v48, 0.0  ;;  %v285_v57 = vsel %vm3071_vm0, %v2294_v55, 0.0  ;;  %v302_v60 = vmul.f32 %v2284_v50, %v2284_v50  ;;  %v303_v61 = vmul.f32 %v2294_v55, %v2294_v55 }
  0x23   : > { %308 = vadd.xlane.f32.xlu2 %v307_v11  ;;  %v340_v58 = vsel %vm3071_vm0, %v300_v54, 0.0  ;;  %v343_v59 = vsel %vm3071_vm0, %v301_v56, 0.0  ;;  %v1882_v54 = vld [vmem:[%s3067_s2 + $0x28] sm:$0xff] }
  0x24   : > { %v346_v62 = vsel %vm3071_vm0, %v302_v60, 0.0  ;;  %v349_v63 = vsel %vm3071_vm0, %v303_v61, 0.0  ;;  %vm807_vm0 = vcmask 851712  }
  0x29   : > { %311 = vadd.xlane.f32.xlu1 %v310_v15  ;;  %253 = vadd.xlane.f32.xlu0 %v252_v16 }
  0x2b   : > { %256 = vadd.xlane.f32.xlu2 %v255_v17 }
  0x31   : > { %259 = vadd.xlane.f32.xlu1 %v258_v21  ;;  %314 = vadd.xlane.f32.xlu0 %v313_v22 }
  0x33   : > { %317 = vadd.xlane.f32.xlu2 %v316_v23 }
  0x39   : > { %320 = vadd.xlane.f32.xlu1 %v319_v27  ;;  %262 = vadd.xlane.f32.xlu0 %v261_v28  ;;  %v3072_v27 = vlaneseq }
  0x3b   : > { %265 = vadd.xlane.f32.xlu2 %v264_v29 }
  0x41   : > { %268 = vadd.xlane.f32.xlu1 %v267_v33  ;;  %323 = vadd.xlane.f32.xlu0 %v322_v34  ;;  %v1884_v33 = vld [vmem:[%s3067_s2 + $0x38] sm:$0xff]  ;;  %v2335_v34 = vand.u32 127, %v3072_v27 }
  0x42   : > { %1001 = vmatpush.bf16.msra.mxu1 %v1884_v33 }
  0x43   : > { %326 = vadd.xlane.f32.xlu2 %v325_v35 }
  0x49   : > { %329 = vadd.xlane.f32.xlu1 %v328_v39  ;;  %271 = vadd.xlane.f32.xlu0 %v270_v40  ;;  %v1883_v39 = vld [vmem:[%s3067_s2 + $0x30] sm:$0xff] }
  0x4a   : > { %1002 = vmatpush.bf16.msra.mxu1 %v1883_v39 }
  0x4b   : > { %274 = vadd.xlane.f32.xlu2 %v273_v41 }
  0x4e   : > { %1003 = vmatpush.bf16.msra.mxu1 %v1882_v54 }
  0x51   : > { %277 = vadd.xlane.f32.xlu1 %v276_v45  ;;  %332 = vadd.xlane.f32.xlu0 %v331_v46 }
  0x53   : > { %335 = vadd.xlane.f32.xlu2 %v334_v47  ;;  %v2356_v47 = vadd.s32 4294967288, %v2335_v34 }
  0x59   : > { %338 = vadd.xlane.f32.xlu1 %v337_v51  ;;  %280 = vadd.xlane.f32.xlu0 %v279_v52 }
  0x5b   : > { %283 = vadd.xlane.f32.xlu2 %v282_v53 }
  0x61   : > { %286 = vadd.xlane.f32.xlu1 %v285_v57  ;;  %341 = vadd.xlane.f32.xlu0 %v340_v58 }
  0x63   : > { %344 = vadd.xlane.f32.xlu2 %v343_v59 }
  0x69   : > { %347 = vadd.xlane.f32.xlu0 %v346_v62  ;;  %350 = vadd.xlane.f32.xlu1 %v349_v63 }
  0x8c   : > { %v248_v2 = vpop.xlane.xlu1 %247  ;;  %624 = vxpose.xlu2.b32.start [1/16] (narrow) %v2184_v1, 16  ;;  %v242_v3 = vpop.xlane.xlu0 %241 }
  0x8d   : > { %v2309_v4 = vmul.f32 0.0625, %v242_v3  ;;  %v2318_v18 = vmul.f32 0.0625, %v248_v2 }
  0x8e   : > { %v306_v6 = vpop.xlane.xlu2 %305 }
  0x8f   : > { %v384_v8 = vmul.f32 %v2309_v4, %v2309_v4  ;;  %v368_v9 = vmul.f32 0.0625, %v306_v6  ;;  %v386_v22 = vmul.f32 %v2318_v18, %v2318_v18  ;;  %v760_v59 = vperm.slane %v2309_v4, %v2335_v34  ;;  %v1881_v4 = vld [vmem:[%s3067_s2 + $0x20] sm:$0xff] }
  0x90   : > { %1004 = vmatpush.bf16.msra.mxu1 %v1881_v4 }
  0x91   : > { %v400_v10 = vsub.f32 %v368_v9, %v384_v8  ;;  %v2387_v9 = vadd.s32 4294967272, %v2335_v34 }
  0x93   : > { %v2313_v11 = vmax.f32 %v400_v10, 1e-12 }
  0x94   : > { %v251_v12 = vpop.xlane.xlu1 %250  ;;  %625 = vxpose.xlu2.b32.cont [2/16] (narrow) %v2193_v5, 16  ;;  %v245_v15 = vpop.xlane.xlu0 %244 }
  0x95   : > { %v2316_v16 = vmul.f32 0.0625, %v245_v15  ;;  %1941 = vrsqrt.f32 %v2313_v11  ;;  %v2341_v36 = vmul.f32 0.0625, %v251_v12  ;;  %vm439_vm7 = vcmp.eq.f32.partialorder %v2313_v11, inf }
  0x96   : > { %v309_v17 = vpop.xlane.xlu2 %308  ;;  %vm441_vm8 = vcmp.eq.f32.partialorder %v2313_v11, 0.0 }
  0x97   : > { %v385_v1 = vmul.f32 %v2316_v16, %v2316_v16  ;;  %v369_v20 = vmul.f32 0.0625, %v309_v17  ;;  %v387_v41 = vmul.f32 %v2341_v36, %v2341_v36  ;;  %v762_v61 = vperm.slane %v2316_v16, %v2356_v47 }
  0x99   : > { %v401_v21 = vsub.f32 %v369_v20, %v385_v1  ;;  %v764_v20 = vsel %vm3075_vm1, %v762_v61, %v760_v59 }
  0x9b   : > { %v2325_v23 = vmax.f32 %v401_v21, 1e-12  ;;  %v2328_v29 = vpop.eup %1941 }
  0x9c   : > { %v312_v24 = vpop.xlane.xlu1 %311  ;;  %626 = vxpose.xlu2.b32.cont [3/16] (narrow) %v2181_v0, 16  ;;  %v254_v5 = vpop.xlane.xlu0 %253  ;;  %v433_v35 = vmul.f32 %v2328_v29, %v2313_v11 }
  0x9d   : > { %v370_v28 = vmul.f32 0.0625, %v312_v24  ;;  %1943 = vrsqrt.f32 %v2325_v23  ;;  %v2351_v42 = vmul.f32 0.0625, %v254_v5  ;;  %v2403_v24 = vadd.s32 4294967256, %v2335_v34  ;;  %v1880_v5 = vld [vmem:[%s3067_s2 + $0x18] sm:$0xff] }
  0x9e   : > { %v257_v30 = vpop.xlane.xlu2 %256  ;;  %v434_v46 = vmul.f32 %v2328_v29, %v433_v35  ;;  %1005 = vmatpush.bf16.msra.mxu1 %v1880_v5  ;;  %vm451_vm9 = vcmp.eq.f32.partialorder %v2325_v23, inf  ;;  %vm453_vm10 = vcmp.eq.f32.partialorder %v2325_v23, 0.0 }
  0x9f   : > { %v402_v32 = vsub.f32 %v370_v28, %v386_v22  ;;  %v388_v52 = vmul.f32 %v2351_v42, %v2351_v42  ;;  %v2377_v2 = vmul.f32 0.0625, %v257_v30  ;;  %v770_v28 = vperm.slane %v2341_v36, %v2387_v9 }
  0xa0   : > { %v435_v60 = vmul.f32 0.5, %v434_v46  ;;  %v2412_v30 = vadd.s32 4294967248, %v2335_v34 }
  0xa1   : > { %v2339_v0 = vmax.f32 %v402_v32, 1e-12  ;;  %v389_v21 = vmul.f32 %v2377_v2, %v2377_v2 }
  0xa2   : > { %v436_v15 = vsub.f32 1.5, %v435_v60 }
  0xa3   : > { %1945 = vrsqrt.f32 %v2339_v0  ;;  %v2347_v40 = vpop.eup %1943  ;;  %vm463_vm11 = vcmp.eq.f32.partialorder %v2339_v0, inf  ;;  %vm465_vm13 = vcmp.eq.f32.partialorder %v2339_v0, 0.0 }
  0xa4   : > { %v260_v44 = vpop.xlane.xlu1 %259  ;;  %627 = vxpose.xlu2.b32.cont [4/16] (narrow) %v2197_v7, 16  ;;  %v315_v45 = vpop.xlane.xlu0 %314  ;;  %v445_v48 = vmul.f32 %v2347_v40, %v2325_v23  ;;  %v2366_v7 = vadd.s32 4294967280, %v2335_v34  ;;  %v437_v33 = vmul.f32 %v2328_v29, %v436_v15  ;;  %v442_v29 = vand.u32 2147483648, %v2313_v11 }
  0xa5   : > { %v371_v51 = vmul.f32 0.0625, %v315_v45  ;;  %v2421_v36 = vmul.f32 0.0625, %v260_v44  ;;  %v1879_v44 = vld [vmem:[%s3067_s2 + $0x10] sm:$0xff]  ;;  %v454_v15 = vand.u32 2147483648, %v2325_v23 }
  0xa6   : > { %v318_v53 = vpop.xlane.xlu2 %317  ;;  %v446_v62 = vmul.f32 %v2347_v40, %v445_v48  ;;  %v766_v8 = vperm.slane %v2318_v18, %v2366_v7  ;;  %v438_v61 = vmul.f32 %v437_v33, %v2313_v11  ;;  %1006 = vmatpush.bf16.msra.mxu1 %v1879_v44 }
  0xa7   : > { %v403_v56 = vsub.f32 %v371_v51, %v387_v41  ;;  %v372_v57 = vmul.f32 0.0625, %v318_v53  ;;  %v2417_v41 = vadd.s32 4294967240, %v2335_v34  ;;  %v2426_v51 = vadd.s32 4294967232, %v2335_v34 }
  0xa8   : > { %v447_v16 = vmul.f32 0.5, %v446_v62  ;;  %v768_v35 = vsel %vm3078_vm2, %v766_v8, %v764_v20  ;;  %v778_v20 = vperm.slane %v2377_v2, %v2403_v24  ;;  %v440_v5 = vsel %vm439_vm7, %v2313_v11, %v438_v61 }
  0xa9   : > { %v2368_v58 = vpop.eup %1945  ;;  %v2379_v3 = vmax.f32 %v403_v56, 1e-12  ;;  %v404_v6 = vsub.f32 %v372_v57, %v388_v52  ;;  %v772_v54 = vsel %vm3076_vm3, %v770_v28, %v768_v35  ;;  %v390_v56 = vmul.f32 %v2421_v36, %v2421_v36 }
  0xaa   : > { %v457_v63 = vmul.f32 %v2368_v58, %v2339_v0  ;;  %v448_v39 = vsub.f32 1.5, %v447_v16  ;;  %v2443_v57 = vadd.s32 4294967224, %v2335_v34  ;;  %v2498_v61 = vadd.s32 4294967208, %v2335_v34 }
  0xab   : > { %1947 = vrsqrt.f32 %v2379_v3  ;;  %v2391_v17 = vmax.f32 %v404_v6, 1e-12  ;;  %vm475_vm7 = vcmp.eq.f32.partialorder %v2379_v3, inf }
  0xac   : > { %v321_v10 = vpop.xlane.xlu1 %320  ;;  %628 = vxpose.xlu2.b32.cont [5/16] (narrow) %v2209_v13, 16  ;;  %v263_v12 = vpop.xlane.xlu0 %262  ;;  %v458_v18 = vmul.f32 %v2368_v58, %v457_v63  ;;  %v2400_v13 = vadd.s32 4294967264, %v2335_v34  ;;  %v449_v62 = vmul.f32 %v2347_v40, %v448_v39 }
  0xad   : > { %v373_v1 = vmul.f32 0.0625, %v321_v10  ;;  %1949 = vrsqrt.f32 %v2391_v17  ;;  %v2453_v63 = vmul.f32 0.0625, %v263_v12  ;;  %v2464_v12 = vadd.s32 4294967216, %v2335_v34 }
  0xae   : > { %v2397_v22 = vpop.xlane.xlu2 %265  ;;  %v459_v46 = vmul.f32 0.5, %v458_v18  ;;  %v774_v52 = vperm.slane %v2351_v42, %v2400_v13  ;;  %v450_v28 = vmul.f32 %v449_v62, %v2325_v23  ;;  %v2502_v62 = vsel %vm441_vm8, %v442_v29, %v440_v5 }
  0xaf   : > { %v405_v32 = vsub.f32 %v373_v1, %v389_v21  ;;  %v391_v40 = vmul.f32 %v2453_v63, %v2453_v63  ;;  %v1878_v1 = vld [vmem:[%s3067_s2 + $0x8] sm:$0xff]  ;;  %v2483_v2 = vmul.f32 0.0625, %v2397_v22  ;;  %v478_v5 = vand.u32 2147483648, %v2379_v3 }
  0xb0   : > { %v460_v6 = vsub.f32 1.5, %v459_v46  ;;  %v776_v16 = vsel %vm3077_vm4, %v774_v52, %v772_v54  ;;  %1007 = vmatpush.bf16.msra.mxu1 %v1878_v1  ;;  %v1877_v54 = vld [vmem:[%s3067_s2] sm:$0xff]  ;;  %v2516_v1 = vadd.s32 4294967200, %v2335_v34  ;;  %vm477_vm8 = vcmp.eq.f32.partialorder %v2379_v3, 0.0 }
  0xb1   : > { %v2419_v45 = vpop.eup %1947  ;;  %v2423_v48 = vmax.f32 %v405_v32, 1e-12  ;;  %v782_v32 = vperm.slane %v2421_v36, %v2412_v30 }
  0xb2   : > { %v469_v53 = vmul.f32 %v2419_v45, %v2379_v3  ;;  %v461_v39 = vmul.f32 %v2368_v58, %v460_v6  ;;  %v466_v58 = vand.u32 2147483648, %v2339_v0  ;;  %v452_v6 = vsel %vm451_vm9, %v2325_v23, %v450_v28 }
  0xb3   : > { %1951 = vrsqrt.f32 %v2423_v48  ;;  %v2448_v60 = vpop.eup %1949  ;;  %v490_v28 = vand.u32 2147483648, %v2391_v17  ;;  %vm487_vm9 = vcmp.eq.f32.partialorder %v2391_v17, inf }
  0xb4   : > { %v2445_v42 = vpop.xlane.xlu1 %268  ;;  %629 = vxpose.xlu2.b32.cont [6/16] (narrow) %v2212_v14, 16  ;;  %v324_v59 = vpop.xlane.xlu0 %323  ;;  %v470_v4 = vmul.f32 %v2419_v45, %v469_v53  ;;  %v481_v8 = vmul.f32 %v2448_v60, %v2391_v17  ;;  %1008 = vmatpush.bf16.msra.mxu1 %v1877_v54 }
  0xb5   : > { %v374_v10 = vmul.f32 0.0625, %v324_v59 }
  0xb6   : > { %v327_v14 = vpop.xlane.xlu2 %326  ;;  %v482_v18 = vmul.f32 %v2448_v60, %v481_v8  ;;  %v471_v46 = vmul.f32 0.5, %v470_v4 }
  0xb7   : > { %v406_v21 = vsub.f32 %v374_v10, %v390_v56  ;;  %v375_v33 = vmul.f32 0.0625, %v327_v14  ;;  %v780_v56 = vsel %vm779_vm5, %v778_v20, %v776_v16  ;;  %v392_v14 = vmul.f32 %v2483_v2, %v2483_v2 }
  0xb8   : > { %v483_v53 = vmul.f32 0.5, %v482_v18  ;;  %v784_v4 = vsel %vm783_vm6, %v782_v32, %v780_v56  ;;  %v472_v10 = vsub.f32 1.5, %v471_v46  ;;  %v838_v20 = vperm.slane %v2502_v62, %v2335_v34 }
  0xb9   : > { %v2479_v35 = vpop.eup %1951  ;;  %v2485_v52 = vmax.f32 %v406_v21, 1e-12  ;;  %v407_v36 = vsub.f32 %v375_v33, %v391_v40  ;;  %v455_v18 = vsel %vm453_vm10, %v454_v15, %v452_v6  ;;  %v786_v32 = vperm.slane %v2453_v63, %v2417_v41 }
  0xba   : > { %v493_v44 = vmul.f32 %v2479_v35, %v2423_v48  ;;  %v484_v16 = vsub.f32 1.5, %v483_v53  ;;  %v361_v33 = vmul.f32 0.0625, %v2445_v42  ;;  %v473_v15 = vmul.f32 %v2419_v45, %v472_v10 }
  0xbb   : > { %1953 = vrsqrt.f32 %v2485_v52  ;;  %v2508_v8 = vmax.f32 %v407_v36, 1e-12  ;;  %v2542_v42 = vadd.s32 4294967192, %v2335_v34  ;;  %v839_v63 = vperm.slane %v455_v18, %v2356_v47 }
  0xbc   : > { %v330_v22 = vpop.xlane.xlu1 %329  ;;  %630 = vxpose.xlu2.b32.cont [7/16] (narrow) %v2222_v19, 16  ;;  %v272_v59 = vpop.xlane.xlu0 %271  ;;  %v462_v19 = vmul.f32 %v461_v39, %v2339_v0  ;;  %v494_v40 = vmul.f32 %v2479_v35, %v493_v44  ;;  %v1892_v39 = vld [vmem:[%s3067_s2 + $0x78] sm:$0xff]  ;;  %v485_v44 = vmul.f32 %v2448_v60, %v484_v16  ;;  %v790_v45 = vperm.slane %v2483_v2, %v2426_v51  ;;  %v1891_v60 = vld [vmem:[%s3067_s2 + $0x70] sm:$0xff] }
  0xbd   : > { %v376_v11 = vmul.f32 0.0625, %v330_v22  ;;  %1955 = vrsqrt.f32 %v2508_v8  ;;  %1014 = vmatpush.bf16.msra.mxu2 %v1892_v39  ;;  %v393_v56 = vmul.f32 %v361_v33, %v361_v33  ;;  %vm799_vm10 = vcmask 720512  }
  0xbe   : > { %v275_v29 = vpop.xlane.xlu2 %274  ;;  %v464_v23 = vsel %vm463_vm11, %v2339_v0, %v462_v19  ;;  %v495_v36 = vmul.f32 0.5, %v494_v40  ;;  %v2551_v22 = vmul.f32 0.0625, %v272_v59  ;;  %vm489_vm11 = vcmp.eq.f32.partialorder %v2391_v17, 0.0 }
  0xbf   : > { %v408_v21 = vsub.f32 %v376_v11, %v392_v14  ;;  %v2561_v10 = vsel %vm465_vm13, %v466_v58, %v464_v23  ;;  %v788_v2 = vsel %vm787_vm12, %v786_v32, %v784_v4  ;;  %v794_v59 = vperm.slane %v361_v33, %v2443_v57  ;;  %v1890_v32 = vld [vmem:[%s3067_s2 + $0x68] sm:$0xff] }
  0xc0   : > { %v502_v11 = vand.u32 2147483648, %v2423_v48  ;;  %v394_v40 = vmul.f32 %v2551_v22, %v2551_v22  ;;  %v486_v0 = vmul.f32 %v485_v44, %v2391_v17  ;;  %v496_v58 = vsub.f32 1.5, %v495_v36 }
  0xc1   : > { %v2531_v46 = vpop.eup %1953  ;;  %v2539_v53 = vmax.f32 %v408_v21, 1e-12  ;;  %vm803_vm13 = vcmask 786112   ;;  %v2575_v4 = vadd.s32 4294967184, %v2335_v34  ;;  %1015 = vmatpush.bf16.msra.mxu2 %v1891_v60  ;;  %v841_v33 = vperm.slane %v2561_v10, %v2366_v7 }
  0xc2   : > { %v505_v54 = vmul.f32 %v2531_v46, %v2485_v52  ;;  %v792_v39 = vsel %vm3073_vm14, %v790_v45, %v788_v2  ;;  %v363_v36 = vmul.f32 0.0625, %v275_v29  ;;  %vm499_vm14 = vcmp.eq.f32.partialorder %v2423_v48, inf }
  0xc3   : > { %1957 = vrsqrt.f32 %v2539_v53  ;;  %v2557_v19 = vpop.eup %1955  ;;  %v796_v44 = vsel %vm3074_vm15, %v794_v59, %v792_v39  ;;  %vm811_vm15 = vcmask 917312   ;;  %v488_v29 = vsel %vm487_vm9, %v2391_v17, %v486_v0 }
  0xc4   : > { %v278_v62 = vpop.xlane.xlu1 %277  ;;  %631 = vxpose.xlu2.b32.cont [8/16] (narrow) %v2233_v25, 16  ;;  %v333_v6 = vpop.xlane.xlu0 %332  ;;  %v474_v25 = vmul.f32 %v473_v15, %v2379_v3  ;;  %v506_v16 = vmul.f32 %v2531_v46, %v505_v54  ;;  %v517_v21 = vmul.f32 %v2557_v19, %v2508_v8  ;;  %v2585_v54 = vadd.s32 4294967176, %v2335_v34 }
  0xc5   : > { %v377_v14 = vmul.f32 0.0625, %v333_v6  ;;  %v2588_v6 = vsel %vm3075_vm1, %v839_v63, %v838_v20  ;;  %v497_v20 = vmul.f32 %v2479_v35, %v496_v58  ;;  %v798_v59 = vperm.slane %v2551_v22, %v2464_v12  ;;  %1016 = vmatpush.bf16.msra.mxu2 %v1890_v32 }
  0xc6   : > { %v336_v18 = vpop.xlane.xlu2 %335  ;;  %v476_v27 = vsel %vm475_vm7, %v2379_v3, %v474_v25  ;;  %v507_v45 = vmul.f32 0.5, %v506_v16  ;;  %v518_v63 = vmul.f32 %v2557_v19, %v517_v21  ;;  %v364_v16 = vmul.f32 0.0625, %v278_v62 }
  0xc7   : > { %v409_v23 = vsub.f32 %v377_v14, %v393_v56  ;;  %v378_v15 = vmul.f32 0.0625, %v336_v18  ;;  %v1889_v14 = vld [vmem:[%s3067_s2 + $0x60] sm:$0xff]  ;;  %v2618_v22 = vsel %vm477_vm8, %v478_v5, %v476_v27  ;;  %vm501_vm7 = vcmp.eq.f32.partialorder %v2423_v48, 0.0 }
  0xc8   : > { %v395_v0 = vmul.f32 %v363_v36, %v363_v36  ;;  %vm815_vm9 = vcmask 982912   ;;  %v2625_v62 = vsel %vm489_vm11, %v490_v28, %v488_v29  ;;  %v802_v32 = vperm.slane %v363_v36, %v2498_v61 }
  0xc9   : > { %v2590_v60 = vpop.eup %1957  ;;  %v2596_v56 = vmax.f32 %v409_v23, 1e-12  ;;  %v410_v2 = vsub.f32 %v378_v15, %v394_v40  ;;  %v498_v27 = vmul.f32 %v497_v20, %v2423_v48  ;;  %v519_v5 = vmul.f32 0.5, %v518_v63  ;;  %1017 = vmatpush.bf16.msra.mxu2 %v1889_v14  ;;  %v1888_v15 = vld [vmem:[%s3067_s2 + $0x58] sm:$0xff] }
  0xca   : > { %v529_v25 = vmul.f32 %v2590_v60, %v2539_v53  ;;  %v800_v39 = vsel %vm799_vm10, %v798_v59, %v796_v44  ;;  %vm511_vm8 = vcmp.eq.f32.partialorder %v2485_v52, inf  ;;  %v806_v36 = vperm.slane %v364_v16, %v2516_v1 }
  0xcb   : > { %1959 = vrsqrt.f32 %v2596_v56  ;;  %v2611_v40 = vmax.f32 %v410_v2, 1e-12  ;;  %vm3079_vm11 = vcmask 1048512   ;;  %v843_v63 = vperm.slane %v2618_v22, %v2387_v9  ;;  %v1887_v22 = vld [vmem:[%s3067_s2 + $0x50] sm:$0xff] }
  0xcc   : > { %v339_v18 = vpop.xlane.xlu1 %338  ;;  %632 = vxpose.xlu2.b32.cont [9/16] (narrow) %v2236_v26, 16  ;;  %v281_v35 = vpop.xlane.xlu0 %280  ;;  %v508_v26 = vsub.f32 1.5, %v507_v45  ;;  %v530_v28 = vmul.f32 %v2590_v60, %v529_v25  ;;  %v845_v59 = vperm.slane %v2625_v62, %v2400_v13  ;;  %v804_v25 = vsel %vm803_vm13, %v802_v32, %v800_v39 }
  0xcd   : > { %v379_v58 = vmul.f32 0.0625, %v339_v18  ;;  %v365_v21 = vmul.f32 0.0625, %v281_v35  ;;  %1961 = vrsqrt.f32 %v2611_v40  ;;  %v500_v18 = vsel %vm499_vm14, %v2423_v48, %v498_v27  ;;  %1018 = vmatpush.bf16.msra.mxu2 %v1888_v15 }
  0xce   : > { %v284_v3 = vpop.xlane.xlu2 %283  ;;  %v509_v14 = vmul.f32 %v2531_v46, %v508_v26  ;;  %v520_v35 = vsub.f32 1.5, %v519_v5  ;;  %v531_v46 = vmul.f32 0.5, %v530_v28  ;;  %v396_v26 = vmul.f32 %v364_v16, %v364_v16 }
  0xcf   : > { %v411_v23 = vsub.f32 %v379_v58, %v395_v0  ;;  %v366_v45 = vmul.f32 0.0625, %v284_v3  ;;  %v810_v44 = vperm.slane %v365_v21, %v2542_v42  ;;  %v808_v32 = vsel %vm807_vm0, %v806_v36, %v804_v25 }
  0xd0   : > { %vm513_vm14 = vcmp.eq.f32.partialorder %v2485_v52, 0.0  ;;  %v510_v16 = vmul.f32 %v509_v14, %v2485_v52  ;;  %v397_v28 = vmul.f32 %v365_v21, %v365_v21  ;;  %v521_v17 = vmul.f32 %v2557_v19, %v520_v35  ;;  %v1886_v21 = vld [vmem:[%s3067_s2 + $0x48] sm:$0xff] }
  0xd1   : > { %v2639_v29 = vmax.f32 %v411_v23, 1e-12  ;;  %v2642_v20 = vpop.eup %1959  ;;  %v814_v3 = vperm.slane %v366_v45, %v2575_v4  ;;  %v812_v2 = vsel %vm811_vm15, %v810_v44, %v808_v32  ;;  %vm523_vm1 = vcmp.eq.f32.partialorder %v2508_v8, inf  ;;  %1019 = vmatpush.bf16.msra.mxu2 %v1887_v22 }
  0xd2   : > { %v541_v0 = vmul.f32 %v2642_v20, %v2596_v56  ;;  %v842_v19 = vsel %vm3078_vm2, %v841_v33, %v2588_v6  ;;  %v522_v10 = vmul.f32 %v521_v17, %v2508_v8  ;;  %vm561_vm2 = vcmp.eq.f32.partialorder %v2611_v40, 0.0 }
  0xd3   : > { %1963 = vrsqrt.f32 %v2639_v29  ;;  %v2659_v58 = vpop.eup %1961  ;;  %v816_v48 = vsel %vm815_vm9, %v814_v3, %v812_v2  ;;  %v844_v22 = vsel %vm3076_vm3, %v843_v63, %v842_v19  ;;  %v512_v2 = vsel %vm511_vm8, %v2485_v52, %v510_v16 }
  0xd4   : > { %v287_v27 = vpop.xlane.xlu1 %286  ;;  %633 = vxpose.xlu2.b32.cont [10/16] (narrow) %v2246_v31, 16  ;;  %v342_v5 = vpop.xlane.xlu0 %341  ;;  %v542_v39 = vmul.f32 %v2642_v20, %v541_v0  ;;  %v553_v23 = vmul.f32 %v2659_v58, %v2611_v40  ;;  %v2674_v31 = vsel %vm501_vm7, %v502_v11, %v500_v18  ;;  %v532_v18 = vsub.f32 1.5, %v531_v46  ;;  %v1885_v46 = vld [vmem:[%s3067_s2 + $0x40] sm:$0xff] }
  0xd5   : > { %v367_v15 = vmul.f32 0.0625, %v287_v27  ;;  %v380_v36 = vmul.f32 0.0625, %v342_v5  ;;  %1020 = vmatpush.bf16.msra.mxu2 %v1886_v21  ;;  %vm525_vm7 = vcmp.eq.f32.partialorder %v2508_v8, 0.0  ;;  %v398_v63 = vmul.f32 %v366_v45, %v366_v45 }
  0xd6   : > { %v345_v25 = vpop.xlane.xlu2 %344  ;;  %v543_v0 = vmul.f32 0.5, %v542_v39  ;;  %v554_v27 = vmul.f32 %v2659_v58, %v553_v23  ;;  %vm535_vm8 = vcmp.eq.f32.partialorder %v2539_v53, inf  ;;  %v538_v45 = vand.u32 2147483648, %v2539_v53 }
  0xd7   : > { %v818_v44 = vperm.slane %v367_v15, %v2585_v54  ;;  %v412_v14 = vsub.f32 %v380_v36, %v396_v26  ;;  %v381_v32 = vmul.f32 0.0625, %v345_v25  ;;  %v399_v6 = vmul.f32 %v367_v15, %v367_v15 }
  0xd8   : > { %v555_v5 = vmul.f32 0.5, %v554_v27  ;;  %v544_v33 = vsub.f32 1.5, %v543_v0  ;;  %v533_v15 = vmul.f32 %v2590_v60, %v532_v18  ;;  %vm537_vm3 = vcmp.eq.f32.partialorder %v2539_v53, 0.0 }
  0xd9   : > { %v1964_v11 = vpop.eup %1963  ;;  %v820_v35 = vsel %vm3079_vm11, %v818_v44, %v816_v48  ;;  %v2692_v23 = vmax.f32 %v412_v14, 1e-12  ;;  %v413_v26 = vsub.f32 %v381_v32, %v397_v28  ;;  %1021 = vmatpush.bf16.msra.mxu2 %v1885_v46  ;;  %v846_v60 = vsel %vm3077_vm4, %v845_v59, %v844_v22 }
  0xda   : > { %v565_v39 = vmul.f32 %v1964_v11, %v2639_v29  ;;  %v870_v36 = vpack.c.bf16 %v820_v35, %v820_v35  ;;  %v556_v27 = vsub.f32 1.5, %v555_v5  ;;  %v3082_v32 = vand.u32 2147483648, %v2485_v52 }
  0xdb   : > { %1965 = vrsqrt.f32 %v2692_v23  ;;  %v2703_v3 = vmax.f32 %v413_v26, 1e-12  ;;  %v524_v19 = vsel %vm523_vm1, %v2508_v8, %v522_v10  ;;  %v847_v35 = vperm.slane %v2674_v31, %v2403_v24 }
  0xdc   : > { %634 = vxpose.xlu2.b32.cont [11/16] (narrow) %v2257_v37, 16  ;;  %1009 = vmatmul.bf16.vlgmr.msra.gmra.mxu1 %v870_v36  ;;  %v348_v16 = vpop.xlane.xlu0 %347  ;;  %v351_v28 = vpop.xlane.xlu1 %350  ;;  %v566_v17 = vmul.f32 %v1964_v11, %v565_v39  ;;  %v545_v37 = vmul.f32 %v2642_v20, %v544_v33  ;;  %v515_v48 = vsel %vm513_vm14, %v3082_v32, %v512_v2  ;;  %vm547_vm4 = vcmp.eq.f32.partialorder %v2596_v56, inf  ;;  %v1876_v33 = vld [vmem:[%s3066_s1 + $0x38] sm:$0xff] }
  0xdd   : > { %v382_v25 = vmul.f32 0.0625, %v348_v16  ;;  %v383_v0 = vmul.f32 0.0625, %v351_v28  ;;  %1967 = vrsqrt.f32 %v2703_v3  ;;  %v534_v20 = vmul.f32 %v533_v15, %v2539_v53  ;;  %728 = vmatpush.bf16.msra.mxu0 %v1876_v33  ;;  %v1875_v16 = vld [vmem:[%s3066_s1 + $0x30] sm:$0xff]  ;;  %v1873_v33 = vld [vmem:[%s3066_s1 + $0x20] sm:$0xff] }
  0xde   : > { %v567_v44 = vmul.f32 0.5, %v566_v17  ;;  %v557_v59 = vmul.f32 %v2659_v58, %v556_v27  ;;  %vm549_vm14 = vcmp.eq.f32.partialorder %v2596_v56, 0.0  ;;  %v550_v52 = vand.u32 2147483648, %v2596_v56 }
  0xdf   : > { %v414_v21 = vsub.f32 %v382_v25, %v398_v63  ;;  %v415_v14 = vsub.f32 %v383_v0, %v399_v6  ;;  %vm559_vm1 = vcmp.eq.f32.partialorder %v2611_v40, inf  ;;  %v546_v31 = vmul.f32 %v545_v37, %v2596_v56 }
  0xe0   : > { %v568_v18 = vsub.f32 1.5, %v567_v44  ;;  %v3083_v58 = vand.u32 2147483648, %v2508_v8  ;;  %v849_v10 = vperm.slane %v515_v48, %v2412_v30  ;;  %v558_v6 = vmul.f32 %v557_v59, %v2611_v40 }
  0xe1   : > { %v2726_v5 = vmax.f32 %v414_v21, 1e-12  ;;  %v2728_v62 = vmax.f32 %v415_v14, 1e-12  ;;  %v1966_v22 = vpop.eup %1965  ;;  %v562_v8 = vand.u32 2147483648, %v2611_v40  ;;  %vm573_vm11 = vcmp.eq.f32.partialorder %v2639_v29, 0.0  ;;  %729 = vmatpush.bf16.msra.mxu0 %v1875_v16 }
  0xe2   : > { %v577_v39 = vmul.f32 %v1966_v22, %v2692_v23  ;;  %v569_v26 = vmul.f32 %v1964_v11, %v568_v18  ;;  %v527_v2 = vsel %vm525_vm7, %v3083_v58, %v524_v19  ;;  %v536_v11 = vsel %vm535_vm8, %v2539_v53, %v534_v20  ;;  %v1874_v18 = vld [vmem:[%s3066_s1 + $0x28] sm:$0xff] }
  0xe3   : > { %1969 = vrsqrt.f32 %v2726_v5  ;;  %v1968_v36 = vpop.eup %1967  ;;  %vm571_vm7 = vcmp.eq.f32.partialorder %v2639_v29, inf  ;;  %v848_v63 = vsel %vm779_vm5, %v847_v35, %v846_v60  ;;  %v548_v28 = vsel %vm547_vm4, %v2596_v56, %v546_v31 }
  0xe4   : > { %1971 = vrsqrt.f32 %v2728_v62  ;;  %635 = vxpose.xlu2.b32.cont [12/16] (narrow) %v2260_v38, 16  ;;  %v578_v38 = vmul.f32 %v1966_v22, %v577_v39  ;;  %v589_v46 = vmul.f32 %v1968_v36, %v2703_v3  ;;  %v570_v17 = vmul.f32 %v569_v26, %v2639_v29 }
  0xe5   : > { %v539_v0 = vsel %vm537_vm3, %v538_v45, %v536_v11  ;;  %v574_v27 = vand.u32 2147483648, %v2639_v29  ;;  %v850_v44 = vsel %vm783_vm6, %v849_v10, %v848_v63  ;;  %v851_v21 = vperm.slane %v527_v2, %v2417_v41  ;;  %730 = vmatpush.bf16.msra.mxu0 %v1874_v18 }
  0xe6   : > { %v579_v15 = vmul.f32 0.5, %v578_v38  ;;  %v590_v25 = vmul.f32 %v1968_v36, %v589_v46  ;;  %v560_v37 = vsel %vm559_vm1, %v2611_v40, %v558_v6  ;;  %vm583_vm4 = vcmp.eq.f32.partialorder %v2692_v23, inf }
  0xe7   : > { %v551_v53 = vsel %vm549_vm14, %v550_v52, %v548_v28  ;;  %vm585_vm3 = vcmp.eq.f32.partialorder %v2692_v23, 0.0  ;;  %v586_v45 = vand.u32 2147483648, %v2692_v23  ;;  %v572_v35 = vsel %vm571_vm7, %v2639_v29, %v570_v17 }
  0xe8   : > { %v580_v60 = vsub.f32 1.5, %v579_v15  ;;  %v591_v32 = vmul.f32 0.5, %v590_v25  ;;  %v563_v52 = vsel %vm561_vm2, %v562_v8, %v560_v37  ;;  %vm595_vm8 = vcmp.eq.f32.partialorder %v2703_v3, inf }
  0xe9   : > { %v1970_v14 = vpop.eup %1969  ;;  %v853_v31 = vperm.slane %v539_v0, %v2426_v51  ;;  %v855_v10 = vperm.slane %v551_v53, %v2443_v57  ;;  %vm597_vm14 = vcmp.eq.f32.partialorder %v2703_v3, 0.0  ;;  %v852_v29 = vsel %vm787_vm12, %v851_v21, %v850_v44  ;;  %731 = vmatpush.bf16.msra.mxu0 %v1873_v33  ;;  %v1900_v33 = vld [vmem:[%s3069_s4 + $0x38] sm:$0xff] }
  0xea   : > { %v1972_v48 = vpop.eup %1971  ;;  %v601_v19 = vmul.f32 %v1970_v14, %v2726_v5  ;;  %v581_v20 = vmul.f32 %v1966_v22, %v580_v60  ;;  %v592_v59 = vsub.f32 1.5, %v591_v32  ;;  %v575_v22 = vsel %vm573_vm11, %v574_v27, %v572_v35  ;;  %v1872_v27 = vld [vmem:[%s3066_s1 + $0x18] sm:$0xff]  ;;  %1114 = vmatpush.bf16.msra.mxu3 %v1900_v33 }
  0xeb   : > { %v613_v56 = vmul.f32 %v1972_v48, %v2728_v62  ;;  %vm3084_vm2 = vcmask 589312   ;;  %v857_v63 = vperm.slane %v563_v52, %v2464_v12  ;;  %vm3085_vm11 = vcmask 654912  }
  0xec   : > { %636 = vxpose.xlu2.b32.cont [13/16] (narrow) %v2270_v43, 16  ;;  %v602_v39 = vmul.f32 %v1970_v14, %v601_v19  ;;  %v582_v26 = vmul.f32 %v581_v20, %v2692_v23  ;;  %v593_v58 = vmul.f32 %v1968_v36, %v592_v59  ;;  %v598_v43 = vand.u32 2147483648, %v2703_v3 }
  0xed   : > { %v614_v2 = vmul.f32 %v1972_v48, %v613_v56  ;;  %v854_v8 = vsel %vm3084_vm2, %v853_v31, %v852_v29  ;;  %v859_v15 = vperm.slane %v575_v22, %v2498_v61  ;;  %vm607_vm1 = vcmp.eq.f32.partialorder %v2726_v5, inf  ;;  %732 = vmatpush.bf16.msra.mxu0 %v1872_v27  ;;  %v1869_v31 = vld [vmem:[%s3066_s1] sm:$0xff]  ;;  %v1898_v29 = vld [vmem:[%s3069_s4 + $0x28] sm:$0xff] }
  0xee   : > { %v603_v40 = vmul.f32 0.5, %v602_v39  ;;  %v584_v36 = vsel %vm583_vm4, %v2692_v23, %v582_v26  ;;  %v594_v11 = vmul.f32 %v593_v58, %v2703_v3  ;;  %v856_v17 = vsel %vm3085_vm11, %v855_v10, %v854_v8  ;;  %v1870_v39 = vld [vmem:[%s3066_s1 + $0x8] sm:$0xff]  ;;  %v904_v8 = vld [vmem:[%s3068_s3] sm:$0x1] }
  0xef   : > { %v615_v6 = vmul.f32 0.5, %v614_v2  ;;  %v587_v38 = vsel %vm585_vm3, %v586_v45, %v584_v36  ;;  %v610_v44 = vand.u32 2147483648, %v2726_v5  ;;  %vm619_vm7 = vcmp.eq.f32.partialorder %v2728_v62, inf }
  0xf0   : > { %v604_v46 = vsub.f32 1.5, %v603_v40  ;;  %v596_v16 = vsel %vm595_vm8, %v2703_v3, %v594_v11  ;;  %v861_v23 = vperm.slane %v587_v38, %v2516_v1  ;;  %v622_v3 = vand.u32 2147483648, %v2728_v62  ;;  %v1897_v38 = vld [vmem:[%s3069_s4 + $0x20] sm:$0xff] }
  0xf1   : > { %v616_v28 = vsub.f32 1.5, %v615_v6  ;;  %v599_v25 = vsel %vm597_vm14, %v598_v43, %v596_v16  ;;  %vm621_vm4 = vcmp.eq.f32.partialorder %v2728_v62, 0.0  ;;  %vm609_vm3 = vcmp.eq.f32.partialorder %v2726_v5, 0.0  ;;  %v1899_v6 = vld [vmem:[%s3069_s4 + $0x30] sm:$0xff] }
  0xf2   : > { %v605_v0 = vmul.f32 %v1970_v14, %v604_v46  ;;  %v858_v14 = vsel %vm799_vm10, %v857_v63, %v856_v17  ;;  %v863_v53 = vperm.slane %v599_v25, %v2542_v42  ;;  %vm3086_vm8 = vcmask 1048512   ;;  %1115 = vmatpush.bf16.msra.mxu3 %v1899_v6  ;;  %v1896_v46 = vld [vmem:[%s3069_s4 + $0x18] sm:$0xff]  ;;  %v1895_v63 = vld [vmem:[%s3069_s4 + $0x10] sm:$0xff]  ;;  %v1894_v17 = vld [vmem:[%s3069_s4 + $0x8] sm:$0xff] }
  0xf3   : > { %v617_v21 = vmul.f32 %v1972_v48, %v616_v28  ;;  %v860_v32 = vsel %vm803_vm13, %v859_v15, %v858_v14  ;;  %v1893_v25 = vld [vmem:[%s3069_s4] sm:$0xff]  ;;  %vm3087_vm14 = vcmask 130048  }
  0xf4   : > { %637 = vxpose.xlu2.b32.cont [14/16] (narrow) %v2281_v49, 16  ;;  %v606_v37 = vmul.f32 %v605_v0, %v2726_v5  ;;  %v862_v49 = vsel %vm807_vm0, %v861_v23, %v860_v32  ;;  %vm3088_vm2 = vmmov %vm3087_vm14 }
  0xf5   : > { %v618_v60 = vmul.f32 %v617_v21, %v2728_v62  ;;  %v864_v20 = vsel %vm811_vm15, %v863_v53, %v862_v49  ;;  %vm3089_vm11 = vmmov %vm3088_vm2 }
  0xf6   : > { %v608_v48 = vsel %vm607_vm1, %v2726_v5, %v606_v37  ;;  %1116 = vmatpush.bf16.msra.mxu3 %v1898_v29  ;;  %vm3090_vm1 = vmmov %vm3088_vm2 }
  0xf7   : > { %v611_v45 = vsel %vm609_vm3, %v610_v44, %v608_v48  ;;  %v620_v19 = vsel %vm619_vm7, %v2728_v62, %v618_v60  ;;  %v1871_v62 = vld [vmem:[%s3066_s1 + $0x10] sm:$0xff]  ;;  %vm3091_vm7 = vmmov %vm3090_vm1 }
  0xf8   : > { %v623_v18 = vsel %vm621_vm4, %v622_v3, %v620_v19  ;;  %v865_v35 = vperm.slane %v611_v45, %v2575_v4  ;;  %733 = vmatpush.bf16.msra.mxu0 %v1871_v62  ;;  %vm3092_vm4 = vmmov %vm3090_vm1 }
  0xf9   : > { %v867_v59 = vperm.slane %v623_v18, %v2585_v54  ;;  %vm3093_vm3 = vmmov %vm3090_vm1 }
  0xfa   : > { %v866_v56 = vsel %vm815_vm9, %v865_v35, %v864_v20  ;;  %1117 = vmatpush.bf16.msra.mxu3 %v1897_v38 }
  0xfb   : > { %v868_v52 = vsel %vm3086_vm8, %v867_v59, %v866_v56  ;;  %vm3094_vm8 = vmmov %vm3090_vm1 }
  0xfc   : > { %638 = vxpose.xlu2.b32.cont [15/16] (narrow) %v2284_v50, 16  ;;  %v871_v5 = vpack.c.bf16 %v868_v52, %v868_v52  ;;  %734 = vmatpush.bf16.msra.mxu0 %v1870_v39 }
  0xfe   : > { %1022 = vmatmul.bf16.vlgmr.msra.gmra.mxu2 %v871_v5  ;;  %1118 = vmatpush.bf16.msra.mxu3 %v1896_v46 }
 0x100   : > { %735 = vmatpush.bf16.msra.mxu0 %v1869_v31 }
 0x102   : > { %1119 = vmatpush.bf16.msra.mxu3 %v1895_v63 }
 0x104   : > { %639 = vxpose.xlu2.b32.end [16/16] (narrow) %v2294_v55, 16 }
 0x106   : > { %1120 = vmatpush.bf16.msra.mxu3 %v1894_v17 }
 0x10a   : > { %1121 = vmatpush.bf16.msra.mxu3 %v1893_v25 }
 0x125   : > { %v640_v50 = vpop.trf.xlu2 }
 0x126   : > { %v656_v26 = vpack.c.bf16 %v640_v50, %v640_v50 }
 0x128   : > { %v676_v55 = vunpack.c.l.b16 %v656_v26 }
 0x12d   : > { %v641_v58 = vpop.trf.xlu2 }
 0x12e   : > { %v657_v2 = vpack.c.bf16 %v641_v58, %v641_v58 }
 0x130   : > { %v677_v10 = vunpack.c.l.b16 %v657_v2 }
 0x132   : > { %v678_v22 = vpack.c.b16 %v677_v10, %v676_v55 }
 0x134   : > { %736 = vmatmul.bf16.vlgmr.msra.gmra.mxu0 %v678_v22 }
 0x159   : > { %v1010_v43 = vpop.f32.mrf.mxu1 }
 0x15a   : > { %v1011_v16 = vadd.f32 %v1010_v43, %v904_v8 }
 0x161   : > { %v1012_v40 = vpop.f32.mrf.mxu1 }
 0x181   : > { %v1023_v36 = vpop.f32.mrf.mxu2 }
 0x182   : > { %v1024_v28 = vadd.f32 %v1023_v36, %v1011_v16  ;;  %v2015_v16 = vld [vmem:[%s2178_s9] sm:$0xff] }
 0x184   : > { %v1027_v15 = vperm.slane %v1024_v28, 0 }
 0x189   : > { %v1025_v11 = vpop.f32.mrf.mxu2 }
 0x1b1   : > { %v737_v0 = vpop.f32.mrf.mxu0 }
 0x1b2   : > { %v1028_v23 = vadd.f32 %v1027_v15, %v737_v0 }
 0x1b4   : > { %v1034_v27 = vmax.f32 %v1028_v23, 0.0  ;;  %v2016_v23 = vld [vmem:[%s2178_s9 + $0x8] sm:$0xff] }
 0x1b6   : > { %v1036_v44 = vpack.c.bf16 %v1034_v27, %v1034_v27 }
 0x1b8   : > { %v1038_v37 = vunpack.c.l.bf16 %v1036_v44 }
 0x1b9   : > { %v739_v21 = vpop.f32.mrf.mxu0 }
 0x1ba   : > { %v1029_v3 = vadd.f32 %v1027_v15, %v739_v21  ;;  %1973 = vtanh.f32 %v1038_v37 }
 0x1bc   : > { %v1035_v14 = vmax.f32 %v1029_v3, 0.0 }
 0x1be   : > { %v1037_v60 = vpack.c.bf16 %v1035_v14, %v1035_v14  ;;  %v2017_v14 = vld [vmem:[%s2178_s9 + $0x10] sm:$0xff] }
 0x1c0   : > { %v1039_v32 = vunpack.c.l.bf16 %v1037_v60  ;;  %v1974_v53 = vpop.eup %1973 }
 0x1c1   : > { %v1042_v48 = vpack.c.bf16 %v1974_v53, %v1974_v53 }
 0x1c2   : > { %1975 = vtanh.f32 %v1039_v32 }
 0x1c3   : > { %v1062_v19 = vunpack.c.l.b16 %v1042_v48  ;;  %v2018_v48 = vld [vmem:[%s2178_s9 + $0x18] sm:$0xff] }
 0x1c8   : > { %v1976_v49 = vpop.eup %1975 }
 0x1c9   : > { %v1043_v45 = vpack.c.bf16 %v1976_v49, %v1976_v49 }
 0x1cb   : > { %v1063_v18 = vunpack.c.l.b16 %v1043_v45 }
 0x1cd   : > { %v1064_v35 = vpack.c.b16 %v1063_v18, %v1062_v19 }
 0x1cf   : > { %1122 = vmatmul.bf16.vlgmr.msra.gmra.mxu3 %v1064_v35 }
 0x252   : > { %v1123_v20 = vpop.f32.mrf.mxu3 }
 0x25a   : > { %v1125_v59 = vpop.f32.mrf.mxu3 }
 0x25b   : > { %v1128_v56 = vmax.f32 %v1123_v20, %v1125_v59 }
 0x25d   : > { %v1129_v52 = vrot.slane %v1128_v56, 4 }
 0x25f   : > { %v1130_v5 = vmax.f32 %v1128_v56, %v1129_v52 }
 0x261   : > { %v1131_v62 = vrot.slane %v1130_v5, 2 }
 0x263   : > { %v1132_v39 = vmax.f32 %v1130_v5, %v1131_v62 }
 0x265   : > { %v1133_v31 = vrot.slane %v1132_v39, 1 }
 0x267   : > { %v1134_v50 = vmax.f32 %v1132_v39, %v1133_v31 }
 0x269   : > { %v1135_v26 = vsub.f32 %v1123_v20, %v1134_v50  ;;  %v1136_v58 = vsub.f32 %v1125_v59, %v1134_v50  ;;  %v2019_v20 = vld [vmem:[%s2178_s9 + $0x20] sm:$0xff]  ;;  %v2020_v50 = vld [vmem:[%s2178_s9 + $0x28] sm:$0xff] }
 0x26b   : > { %v1137_v2 = vmul.f32 1.442695, %v1135_v26  ;;  %v1139_v55 = vmul.f32 1.442695, %v1136_v58 }
 0x26d   : > { %1977 = vpow2.f32 %v1137_v2 }
 0x26e   : > { %1979 = vpow2.f32 %v1139_v55 }
 0x273   : > { %v1978_v10 = vpop.eup %1977 }
 0x274   : > { %v1980_v22 = vpop.eup %1979 }
 0x275   : > { %v1141_v43 = vadd.f32 %v1980_v22, %v1978_v10 }
 0x277   : > { %v1142_v40 = vrot.slane %v1141_v43, 4 }
 0x279   : > { %v1143_v33 = vadd.f32 %v1142_v40, %v1141_v43 }
 0x27b   : > { %v1144_v36 = vrot.slane %v1143_v33, 2 }
 0x27d   : > { %v1145_v11 = vadd.f32 %v1144_v36, %v1143_v33 }
 0x27f   : > { %v1146_v6 = vrot.slane %v1145_v11, 1 }
 0x281   : > { %v1147_v29 = vadd.f32 %v1146_v6, %v1145_v11  ;;  %v2022_v6 = vld [vmem:[%s2178_s9 + $0x38] sm:$0xff] }
 0x283   : > { %1981 = vrcp.f32 %v1147_v29 }
 0x289   : > { %v1982_v38 = vpop.eup %1981 }
 0x28a   : > { %v1149_v46 = vmul.f32 %v1982_v38, %v1978_v10  ;;  %v1150_v8 = vmul.f32 %v1982_v38, %v1980_v22  ;;  %v2021_v22 = vld [vmem:[%s2178_s9 + $0x30] sm:$0xff] }
 0x28c   : > { %1151 = vxpose.xlu0.b32.start [1/2] (short) %v1149_v46, 128 }
 0x294   : > { %1152 = vxpose.xlu0.b32.end [2/2] (short) %v1150_v8, 128 }
 0x330   : > { %v1167_v63 = vpop.trf.xlu0 }
 0x331   : > { %v1183_v28 = vmul.f32 %v2015_v16, %v1167_v63 }
 0x333   : > { %v1199_v17 = vsel %vm3087_vm14, %v1183_v28, 0.0  ;;  %v1247_v15 = vmul.f32 %v2015_v16, %v1183_v28  ;;  %vm3095_vm14 = vmmov %vm3090_vm1  ;;  %v2023_v28 = vld [vmem:[%s2178_s9 + $0x40] sm:$0xff] }
 0x334   : > { %1200 = vadd.xlane.f32.xlu1 %v1199_v17 }
 0x335   : > { %v1263_v0 = vsel %vm3088_vm2, %v1247_v15, 0.0  ;;  %vm3096_vm2 = vmmov %vm3090_vm1 }
 0x338   : > { %v1168_v25 = vpop.trf.xlu0 }
 0x339   : > { %v1184_v27 = vmul.f32 %v2016_v23, %v1168_v25  ;;  %v2024_v25 = vld [vmem:[%s2178_s9 + $0x48] sm:$0xff] }
 0x33b   : > { %v1202_v44 = vsel %vm3089_vm11, %v1184_v27, 0.0  ;;  %v1248_v21 = vmul.f32 %v2016_v23, %v1184_v27  ;;  %vm3097_vm11 = vmmov %vm3090_vm1 }
 0x33c   : > { %1264 = vadd.xlane.f32.xlu1 %v1263_v0 }
 0x33d   : > { %v1266_v3 = vsel %vm3090_vm1, %v1248_v21, 0.0 }
 0x340   : > { %v1169_v37 = vpop.trf.xlu0 }
 0x341   : > { %v1185_v60 = vmul.f32 %v2017_v14, %v1169_v37 }
 0x343   : > { %v1205_v32 = vsel %vm3091_vm7, %v1185_v60, 0.0  ;;  %v1249_v5 = vmul.f32 %v2017_v14, %v1185_v60  ;;  %vm3098_vm7 = vmmov %vm3090_vm1 }
 0x344   : > { %1203 = vadd.xlane.f32.xlu1 %v1202_v44 }
 0x345   : > { %v1269_v31 = vsel %vm3096_vm2, %v1249_v5, 0.0  ;;  %vm3103_vm2 = vmmov %vm3090_vm1 }
 0x348   : > { %v1170_v53 = vpop.trf.xlu0 }
 0x349   : > { %v1186_v49 = vmul.f32 %v2018_v48, %v1170_v53 }
 0x34b   : > { %v1208_v45 = vsel %vm3092_vm4, %v1186_v49, 0.0  ;;  %v1250_v19 = vmul.f32 %v2018_v48, %v1186_v49  ;;  %vm3099_vm4 = vmmov %vm3090_vm1 }
 0x34c   : > { %1267 = vadd.xlane.f32.xlu1 %v1266_v3 }
 0x34d   : > { %v1272_v35 = vsel %vm3093_vm3, %v1250_v19, 0.0  ;;  %vm3100_vm3 = vmmov %vm3090_vm1 }
 0x350   : > { %v1171_v18 = vpop.trf.xlu0 }
 0x351   : > { %v1187_v59 = vmul.f32 %v2019_v20, %v1171_v18 }
 0x353   : > { %v1211_v56 = vsel %vm3094_vm8, %v1187_v59, 0.0  ;;  %v1251_v52 = vmul.f32 %v2019_v20, %v1187_v59  ;;  %vm3101_vm8 = vmmov %vm3090_vm1 }
 0x354   : > { %1206 = vadd.xlane.f32.xlu1 %v1205_v32 }
 0x355   : > { %v1275_v39 = vsel %vm3095_vm14, %v1251_v52, 0.0  ;;  %vm3102_vm14 = vmmov %vm3090_vm1 }
 0x358   : > { %v1172_v62 = vpop.trf.xlu0 }
 0x359   : > { %v1188_v26 = vmul.f32 %v2020_v50, %v1172_v62 }
 0x35b   : > { %v1214_v58 = vsel %vm3097_vm11, %v1188_v26, 0.0  ;;  %v1252_v2 = vmul.f32 %v2020_v50, %v1188_v26  ;;  %vm3104_vm11 = vmmov %vm3090_vm1 }
 0x35c   : > { %1209 = vadd.xlane.f32.xlu1 %v1208_v45 }
 0x35d   : > { %v1278_v10 = vsel %vm3090_vm1, %v1252_v2, 0.0 }
 0x360   : > { %v1173_v55 = vpop.trf.xlu0 }
 0x361   : > { %v1189_v43 = vmul.f32 %v2021_v22, %v1173_v55 }
 0x363   : > { %v1217_v40 = vsel %vm3098_vm7, %v1189_v43, 0.0  ;;  %v1253_v33 = vmul.f32 %v2021_v22, %v1189_v43  ;;  %vm3105_vm7 = vcmask 130112  }
 0x364   : > { %1273 = vadd.xlane.f32.xlu1 %v1272_v35 }
 0x365   : > { %v1281_v11 = vsel %vm3099_vm4, %v1253_v33, 0.0  ;;  %vm3106_vm4 = vmmov %vm3090_vm1 }
 0x368   : > { %v1174_v36 = vpop.trf.xlu0 }
 0x369   : > { %v1190_v29 = vmul.f32 %v2022_v6, %v1174_v36 }
 0x36b   : > { %v1220_v46 = vsel %vm3100_vm3, %v1190_v29, 0.0  ;;  %v1254_v8 = vmul.f32 %v2022_v6, %v1190_v29  ;;  %vm3107_vm3 = vcmask 195712  }
 0x36c   : > { %1212 = vadd.xlane.f32.xlu1 %v1211_v56  ;;  %v2025_v56 = vld [vmem:[%s2178_s9 + $0x50] sm:$0xff] }
 0x36d   : > { %v1284_v16 = vsel %vm3101_vm8, %v1254_v8, 0.0  ;;  %vm3108_vm8 = vmmov %vm3090_vm1 }
 0x370   : > { %v1175_v38 = vpop.trf.xlu0 }
 0x371   : > { %v1191_v17 = vmul.f32 %v2023_v28, %v1175_v38 }
 0x373   : > { %v1223_v23 = vsel %vm3102_vm14, %v1191_v17, 0.0  ;;  %v1255_v14 = vmul.f32 %v2023_v28, %v1191_v17  ;;  %vm3109_vm14 = vmmov %vm3090_vm1 }
 0x374   : > { %1276 = vadd.xlane.f32.xlu1 %v1275_v39 }
 0x375   : > { %1270 = vadd.xlane.f32.xlu0 %v1269_v31  ;;  %v1287_v53 = vsel %vm3104_vm11, %v1255_v14, 0.0  ;;  %vm3110_vm11 = vcmask 261312  }
 0x378   : > { %v1176_v63 = vpop.trf.xlu0 }
 0x379   : > { %v1192_v0 = vmul.f32 %v2024_v25, %v1176_v63 }
 0x37b   : > { %v1256_v27 = vmul.f32 %v2024_v25, %v1192_v0  ;;  %v1226_v18 = vsel %vm3090_vm1, %v1192_v0, 0.0 }
 0x37c   : > { %1215 = vadd.xlane.f32.xlu1 %v1214_v58 }
 0x37d   : > { %v1290_v44 = vsel %vm3103_vm2, %v1256_v27, 0.0 }
 0x37e   : > { %1291 = vadd.xlane.f32.xlu2 %v1290_v44 }
 0x380   : > { %v1177_v21 = vpop.trf.xlu0 }
 0x381   : > { %v1193_v52 = vmul.f32 %v2025_v56, %v1177_v21 }
 0x383   : > { %v1229_v26 = vsel %vm3106_vm4, %v1193_v52, 0.0  ;;  %v1257_v22 = vmul.f32 %v2025_v56, %v1193_v52  ;;  %v2027_v56 = vld [vmem:[%s2178_s9 + $0x60] sm:$0xff] }
 0x384   : > { %1279 = vadd.xlane.f32.xlu1 %v1278_v10 }
 0x385   : > { %v1293_v29 = vsel %vm3108_vm8, %v1257_v22, 0.0 }
 0x388   : > { %v1178_v48 = vpop.trf.xlu0 }
 0x38c   : > { %1218 = vadd.xlane.f32.xlu1 %v1217_v40 }
 0x390   : > { %v1179_v50 = vpop.trf.xlu0 }
 0x391   : > { %v1195_v52 = vmul.f32 %v2027_v56, %v1179_v50 }
 0x393   : > { %v1259_v22 = vmul.f32 %v2027_v56, %v1195_v52 }
 0x394   : > { %1282 = vadd.xlane.f32.xlu1 %v1281_v11 }
 0x398   : > { %v2915_v36 = vpop.trf.xlu0 }
 0x39c   : > { %1221 = vadd.xlane.f32.xlu1 %v1220_v46  ;;  %v2026_v46 = vld [vmem:[%s2178_s9 + $0x58] sm:$0xff] }
 0x39d   : > { %v1194_v8 = vmul.f32 %v2026_v46, %v1178_v48 }
 0x39f   : > { %v1232_v25 = vsel %vm3109_vm14, %v1194_v8, 0.0  ;;  %vm3112_vm14 = vmmov %vm3108_vm8 }
 0x3a0   : > { %v2922_v21 = vpop.trf.xlu0 }
 0x3a4   : > { %1285 = vadd.xlane.f32.xlu1 %v1284_v16 }
 0x3a7   : > { %v1201_v15 = vpop.xlane.xlu1 %1200 }
 0x3a8   : > { %v1311_v37 = vmul.f32 %v1201_v15, %v1201_v15  ;;  %v1567_v45 = vperm.slane %v1201_v15, %v2335_v34 }
 0x3ac   : > { %1224 = vadd.xlane.f32.xlu1 %v1223_v23 }
 0x3af   : > { %v1265_v3 = vpop.xlane.xlu1 %1264 }
 0x3b0   : > { %v1327_v60 = vsub.f32 %v1265_v3, %v1311_v37 }
 0x3b2   : > { %v1343_v32 = vmax.f32 %v1327_v60, 1e-12 }
 0x3b4   : > { %1983 = vrsqrt.f32 %v1343_v32  ;;  %1288 = vadd.xlane.f32.xlu1 %v1287_v53  ;;  %vm1366_vm2 = vcmp.eq.f32.partialorder %v1343_v32, inf  ;;  %v1369_v44 = vand.u32 2147483648, %v1343_v32  ;;  %vm1368_vm1 = vcmp.eq.f32.partialorder %v1343_v32, 0.0 }
 0x3b7   : > { %v1204_v49 = vpop.xlane.xlu1 %1203 }
 0x3b8   : > { %v1568_v19 = vperm.slane %v1204_v49, %v2356_v47  ;;  %v1312_v5 = vmul.f32 %v1204_v49, %v1204_v49  ;;  %v1258_v49 = vmul.f32 %v2026_v46, %v1194_v8 }
 0x3ba   : > { %v1984_v35 = vpop.eup %1983  ;;  %v1569_v20 = vsel %vm3105_vm7, %v1568_v19, %v1567_v45 }
 0x3bb   : > { %v1360_v59 = vmul.f32 %v1984_v35, %v1343_v32 }
 0x3bc   : > { %1227 = vadd.xlane.f32.xlu1 %v1226_v18 }
 0x3bd   : > { %v1361_v62 = vmul.f32 %v1984_v35, %v1360_v59  ;;  %v1296_v59 = vsel %vm3108_vm8, %v1258_v49, 0.0 }
 0x3bf   : > { %v1268_v39 = vpop.xlane.xlu1 %1267  ;;  %v1362_v2 = vmul.f32 0.5, %v1361_v62 }
 0x3c0   : > { %v1328_v31 = vsub.f32 %v1268_v39, %v1312_v5  ;;  %v2934_v5 = vpop.trf.xlu0 }
 0x3c1   : > { %v1363_v55 = vsub.f32 1.5, %v1362_v2 }
 0x3c2   : > { %v1344_v58 = vmax.f32 %v1328_v31, 1e-12 }
 0x3c3   : > { %v1364_v11 = vmul.f32 %v1984_v35, %v1363_v55 }
 0x3c4   : > { %1985 = vrsqrt.f32 %v1344_v58  ;;  %1230 = vadd.xlane.f32.xlu1 %v1229_v26  ;;  %vm1378_vm7 = vcmp.eq.f32.partialorder %v1344_v58, inf  ;;  %v1381_v14 = vand.u32 2147483648, %v1344_v58  ;;  %vm1380_vm4 = vcmp.eq.f32.partialorder %v1344_v58, 0.0 }
 0x3c5   : > { %v1365_v63 = vmul.f32 %v1364_v11, %v1343_v32 }
 0x3c7   : > { %v1207_v10 = vpop.xlane.xlu1 %1206  ;;  %v1367_v23 = vsel %vm1366_vm2, %v1343_v32, %v1365_v63  ;;  %vm3113_vm2 = vcmask 326912  }
 0x3c8   : > { %v1570_v43 = vperm.slane %v1207_v10, %v2366_v7  ;;  %v1370_v3 = vsel %vm1368_vm1, %v1369_v44, %v1367_v23  ;;  %v1313_v2 = vmul.f32 %v1207_v10, %v1207_v10  ;;  %vm3115_vm1 = vmmov %vm3108_vm8 }
 0x3c9   : > { %v1614_v18 = vperm.slane %v1370_v3, %v2335_v34  ;;  %v1235_v34 = vsel %vm3112_vm14, %v1195_v52, 0.0 }
 0x3ca   : > { %v1986_v40 = vpop.eup %1985  ;;  %v1571_v33 = vsel %vm3107_vm3, %v1570_v43, %v1569_v20  ;;  %vm3111_vm3 = vcmask 130112  }
 0x3cb   : > { %v1372_v6 = vmul.f32 %v1986_v40, %v1344_v58 }
 0x3cc   : > { %1294 = vadd.xlane.f32.xlu1 %v1293_v29 }
 0x3cd   : > { %v1373_v38 = vmul.f32 %v1986_v40, %v1372_v6 }
 0x3cf   : > { %v1374_v16 = vmul.f32 0.5, %v1373_v38  ;;  %v1210_v28 = vpop.xlane.xlu1 %1209  ;;  %v2028_v38 = vld [vmem:[%s2178_s9 + $0x68] sm:$0xff] }
 0x3d0   : > { %v1572_v17 = vperm.slane %v1210_v28, %v2387_v9  ;;  %v1314_v60 = vmul.f32 %v1210_v28, %v1210_v28  ;;  %v1196_v46 = vmul.f32 %v2028_v38, %v2915_v36 }
 0x3d1   : > { %v1375_v15 = vsub.f32 1.5, %v1374_v16 }
 0x3d2   : > { %v1573_v0 = vsel %vm3110_vm11, %v1572_v17, %v1571_v33  ;;  %vm3114_vm11 = vmmov %vm3108_vm8  ;;  %v1238_v28 = vsel %vm3115_vm1, %v1196_v46, 0.0 }
 0x3d3   : > { %v1376_v27 = vmul.f32 %v1986_v40, %v1375_v15  ;;  %v1299_v29 = vsel %vm3114_vm11, %v1259_v22, 0.0 }
 0x3d4   : > { %1233 = vadd.xlane.f32.xlu1 %v1232_v25 }
 0x3d5   : > { %v1377_v37 = vmul.f32 %v1376_v27, %v1344_v58 }
 0x3d7   : > { %v1379_v53 = vsel %vm1378_vm7, %v1344_v58, %v1377_v37  ;;  %v1274_v48 = vpop.xlane.xlu1 %1273  ;;  %vm3116_vm7 = vmmov %vm3115_vm1 }
 0x3d8   : > { %v1382_v45 = vsel %vm1380_vm4, %v1381_v14, %v1379_v53  ;;  %v1330_v19 = vsub.f32 %v1274_v48, %v1314_v60  ;;  %v1260_v60 = vmul.f32 %v2028_v38, %v1196_v46 }
 0x3d9   : > { %v1615_v35 = vperm.slane %v1382_v45, %v2356_v47 }
 0x3da   : > { %v2926_v20 = vmax.f32 %v1330_v19, 1e-12 }
 0x3db   : > { %v2929_v32 = vsel %vm3111_vm3, %v1615_v35, %v1614_v18 }
 0x3dc   : > { %1987 = vrsqrt.f32 %v2926_v20  ;;  %1297 = vadd.xlane.f32.xlu1 %v1296_v59  ;;  %v1302_v59 = vsel %vm3116_vm7, %v1260_v60, 0.0  ;;  %vm1402_vm4 = vcmp.eq.f32.partialorder %v2926_v20, inf  ;;  %vm1404_vm3 = vcmp.eq.f32.partialorder %v2926_v20, 0.0 }
 0x3dd   : > { %vm3117_vm7 = vcmask 195712  }
 0x3df   : > { %v1213_v62 = vpop.xlane.xlu1 %1212 }
 0x3e0   : > { %v1574_v39 = vperm.slane %v1213_v62, %v2400_v13  ;;  %v1315_v58 = vmul.f32 %v1213_v62, %v1213_v62  ;;  %v2029_v62 = vld [vmem:[%s2178_s9 + $0x70] sm:$0xff] }
 0x3e2   : > { %v1988_v47 = vpop.eup %1987  ;;  %v1575_v31 = vsel %vm3113_vm2, %v1574_v39, %v1573_v0  ;;  %v1197_v39 = vmul.f32 %v2029_v62, %v2922_v21 }
 0x3e3   : > { %v1396_v26 = vmul.f32 %v1988_v47, %v2926_v20 }
 0x3e4   : > { %1236 = vadd.xlane.f32.xlu1 %v1235_v34  ;;  %v1241_v21 = vsel %vm3115_vm1, %v1197_v39, 0.0 }
 0x3e5   : > { %v1397_v40 = vmul.f32 %v1988_v47, %v1396_v26 }
 0x3e7   : > { %v1277_v55 = vpop.xlane.xlu1 %1276  ;;  %v1398_v8 = vmul.f32 0.5, %v1397_v40 }
 0x3e8   : > { %v1331_v43 = vsub.f32 %v1277_v55, %v1315_v58  ;;  %v1271_v50 = vpop.xlane.xlu0 %1270 }
 0x3e9   : > { %v1329_v33 = vsub.f32 %v1271_v50, %v1313_v2  ;;  %v1399_v16 = vsub.f32 1.5, %v1398_v8 }
 0x3ea   : > { %v1347_v11 = vmax.f32 %v1331_v43, 1e-12 }
 0x3eb   : > { %v1345_v6 = vmax.f32 %v1329_v33, 1e-12  ;;  %v1400_v27 = vmul.f32 %v1988_v47, %v1399_v16  ;;  %v1405_v47 = vand.u32 2147483648, %v2926_v20 }
 0x3ec   : > { %1989 = vrsqrt.f32 %v1347_v11  ;;  %1300 = vadd.xlane.f32.xlu1 %v1299_v29  ;;  %vm1414_vm8 = vcmp.eq.f32.partialorder %v1347_v11, inf  ;;  %vm1416_vm14 = vcmp.eq.f32.partialorder %v1347_v11, 0.0  ;;  %v1417_v58 = vand.u32 2147483648, %v1347_v11 }
 0x3ed   : > { %1991 = vrsqrt.f32 %v1345_v6  ;;  %v1401_v49 = vmul.f32 %v1400_v27, %v2926_v20  ;;  %vm1390_vm2 = vcmp.eq.f32.partialorder %v1345_v6, inf  ;;  %v1393_v2 = vand.u32 2147483648, %v1345_v6 }
 0x3ee   : > { %vm1392_vm11 = vcmp.eq.f32.partialorder %v1345_v6, 0.0 }
 0x3ef   : > { %v1216_v63 = vpop.xlane.xlu1 %1215  ;;  %v1403_v52 = vsel %vm1402_vm4, %v2926_v20, %v1401_v49  ;;  %vm3118_vm4 = vcmask 261312  }
 0x3f0   : > { %v1576_v10 = vperm.slane %v1216_v63, %v2403_v24  ;;  %v1316_v3 = vmul.f32 %v1216_v63, %v1216_v63  ;;  %v1406_v22 = vsel %vm1404_vm3, %v1405_v47, %v1403_v52  ;;  %vm3119_vm3 = vcmask 326912  }
 0x3f1   : > { %v1619_v46 = vperm.slane %v1406_v22, %v2387_v9 }
 0x3f2   : > { %v1990_v17 = vpop.eup %1989  ;;  %v1577_v15 = vsel %vm779_vm5, %v1576_v10, %v1575_v31 }
 0x3f3   : > { %v1992_v25 = vpop.eup %1991  ;;  %v1408_v0 = vmul.f32 %v1990_v17, %v1347_v11 }
 0x3f4   : > { %v1384_v23 = vmul.f32 %v1992_v25, %v1345_v6  ;;  %1239 = vadd.xlane.f32.xlu1 %v1238_v28 }
 0x3f5   : > { %v1409_v44 = vmul.f32 %v1990_v17, %v1408_v0 }
 0x3f6   : > { %v1385_v37 = vmul.f32 %v1992_v25, %v1384_v23 }
 0x3f7   : > { %v1410_v36 = vmul.f32 0.5, %v1409_v44  ;;  %v1280_v14 = vpop.xlane.xlu1 %1279 }
 0x3f8   : > { %v1386_v53 = vmul.f32 0.5, %v1385_v37  ;;  %v1332_v48 = vsub.f32 %v1280_v14, %v1316_v3 }
 0x3f9   : > { %v1411_v45 = vsub.f32 1.5, %v1410_v36 }
 0x3fa   : > { %v1387_v19 = vsub.f32 1.5, %v1386_v53  ;;  %v1348_v18 = vmax.f32 %v1332_v48, 1e-12 }
 0x3fb   : > { %v1412_v35 = vmul.f32 %v1990_v17, %v1411_v45 }
 0x3fc   : > { %v1388_v56 = vmul.f32 %v1992_v25, %v1387_v19  ;;  %1993 = vrsqrt.f32 %v1348_v18  ;;  %1303 = vadd.xlane.f32.xlu1 %v1302_v59  ;;  %v1261_v25 = vmul.f32 %v2029_v62, %v1197_v39  ;;  %v1429_v37 = vand.u32 2147483648, %v1348_v18 }
 0x3fd   : > { %v1413_v34 = vmul.f32 %v1412_v35, %v1347_v11 }
 0x3fe   : > { %v1389_v31 = vmul.f32 %v1388_v56, %v1345_v6 }
 0x3ff   : > { %v1415_v26 = vsel %vm1414_vm8, %v1347_v11, %v1413_v34  ;;  %v1219_v55 = vpop.xlane.xlu1 %1218  ;;  %vm3120_vm8 = vmmov %vm3115_vm1 }
 0x400   : > { %v1391_v43 = vsel %vm1390_vm2, %v1345_v6, %v1389_v31  ;;  %v1578_v50 = vperm.slane %v1219_v55, %v2412_v30  ;;  %v1418_v40 = vsel %vm1416_vm14, %v1417_v58, %v1415_v26  ;;  %v1317_v16 = vmul.f32 %v1219_v55, %v1219_v55 }
 0x401   : > { %v1394_v33 = vsel %vm1392_vm11, %v1393_v2, %v1391_v43  ;;  %v1621_v8 = vperm.slane %v1418_v40, %v2400_v13  ;;  %v1305_v13 = vsel %vm3120_vm8, %v1261_v25, 0.0  ;;  %vm1426_vm14 = vcmp.eq.f32.partialorder %v1348_v18, inf  ;;  %vm3121_vm11 = vmmov %vm3115_vm1 }
 0x402   : > { %v1994_v29 = vpop.eup %1993  ;;  %v1617_v20 = vperm.slane %v1394_v33, %v2366_v7  ;;  %v1579_v38 = vsel %vm783_vm6, %v1578_v50, %v1577_v15  ;;  %vm1428_vm2 = vcmp.eq.f32.partialorder %v1348_v18, 0.0 }
 0x403   : > { %v1420_v11 = vmul.f32 %v1994_v29, %v1348_v18 }
 0x404   : > { %v1618_v63 = vsel %vm3117_vm7, %v1617_v20, %v2929_v32  ;;  %1242 = vadd.xlane.f32.xlu1 %v1241_v21  ;;  %v2030_v32 = vld [vmem:[%s2178_s9 + $0x78] sm:$0xff]  ;;  %s215_s9 = sand.u32 1, %s2085_s19  }
 0x405   : > { %v1620_v6 = vsel %vm3118_vm4, %v1619_v46, %v1618_v63  ;;  %v1421_v10 = vmul.f32 %v1994_v29, %v1420_v11  ;;  %v1198_v27 = vmul.f32 %v2030_v32, %v2934_v5  ;;  %s3012_s16 = sshll.u32 %s215_s9, 1  ;;  %s1655_s7 = scalar_lea.sflag [#allocation3], %s215_s9 }
 0x406   : > { %v1622_v28 = vsel %vm3119_vm3, %v1621_v8, %v1620_v6  ;;  %s217_s22 = scalar_lea.vmem [#allocation2], %s3012_s16 }
 0x407   : > { %v1422_v17 = vmul.f32 0.5, %v1421_v10  ;;  %v1283_v7 = vpop.xlane.xlu1 %1282  ;;  %v1244_v48 = vsel %vm3121_vm11, %v1198_v27, 0.0  ;;  %s1667_s30 = sshll.u32 %s217_s22, 4  ;;  %s1668_s30 = int_to_ptr.vmem [resolvable:$true] %s1667_s30 }
 0x408   : > { %v1333_v15 = vsub.f32 %v1283_v7, %v1317_v16 }
 0x409   : > { %v1423_v0 = vsub.f32 1.5, %v1422_v17  ;;  %v1292_v17 = vpop.xlane.xlu2 %1291 }
 0x40a   : > { %v1349_v9 = vmax.f32 %v1333_v15, 1e-12 }
 0x40b   : > { %v1424_v23 = vmul.f32 %v1994_v29, %v1423_v0 }
 0x40c   : > { %1995 = vrsqrt.f32 %v1349_v9  ;;  %1306 = vadd.xlane.f32.xlu1 %v1305_v13  ;;  %vm1438_vm7 = vcmp.eq.f32.partialorder %v1349_v9, inf  ;;  %v1441_v26 = vand.u32 2147483648, %v1349_v9  ;;  %vm1440_vm4 = vcmp.eq.f32.partialorder %v1349_v9, 0.0 }
 0x40d   : > { %v1425_v44 = vmul.f32 %v1424_v23, %v1348_v18 }
 0x40f   : > { %v1427_v3 = vsel %vm1426_vm14, %v1348_v18, %v1425_v44  ;;  %v1222_v36 = vpop.xlane.xlu1 %1221  ;;  %v1262_v18 = vmul.f32 %v2030_v32, %v1198_v27 }
 0x410   : > { %v1430_v14 = vsel %vm1428_vm2, %v1429_v37, %v1427_v3  ;;  %v1580_v60 = vperm.slane %v1222_v36, %v2417_v41  ;;  %v1318_v59 = vmul.f32 %v1222_v36, %v1222_v36 }
 0x411   : > { %v1623_v53 = vperm.slane %v1430_v14, %v2403_v24  ;;  %v1308_v24 = vsel %vm3115_vm1, %v1262_v18, 0.0 }
 0x412   : > { %v1996_v49 = vpop.eup %1995  ;;  %v1581_v45 = vsel %vm787_vm12, %v1580_v60, %v1579_v38 }
 0x413   : > { %v1432_v19 = vmul.f32 %v1996_v49, %v1349_v9  ;;  %v1624_v35 = vsel %vm779_vm5, %v1623_v53, %v1622_v28  ;;  %vm3122_vm5 = vcmask 589312  }
 0x414   : > { %1245 = vadd.xlane.f32.xlu1 %v1244_v48 }
 0x415   : > { %v1433_v5 = vmul.f32 %v1996_v49, %v1432_v19 }
 0x417   : > { %v1434_v56 = vmul.f32 0.5, %v1433_v5  ;;  %v1286_v52 = vpop.xlane.xlu1 %1285 }
 0x418   : > { %v1334_v62 = vsub.f32 %v1286_v52, %v1318_v59 }
 0x419   : > { %v1435_v39 = vsub.f32 1.5, %v1434_v56 }
 0x41a   : > { %v1350_v34 = vmax.f32 %v1334_v62, 1e-12 }
 0x41b   : > { %v1436_v47 = vmul.f32 %v1996_v49, %v1435_v39 }
 0x41c   : > { %1997 = vrsqrt.f32 %v1350_v34  ;;  %1309 = vadd.xlane.f32.xlu1 %v1308_v24  ;;  %vm1450_vm3 = vcmp.eq.f32.partialorder %v1350_v34, inf  ;;  %v1453_v16 = vand.u32 2147483648, %v1350_v34  ;;  %vm1452_vm8 = vcmp.eq.f32.partialorder %v1350_v34, 0.0 }
 0x41d   : > { %v1437_v31 = vmul.f32 %v1436_v47, %v1349_v9 }
 0x41f   : > { %v1439_v58 = vsel %vm1438_vm7, %v1349_v9, %v1437_v31  ;;  %v1225_v2 = vpop.xlane.xlu1 %1224 }
 0x420   : > { %v1442_v55 = vsel %vm1440_vm4, %v1441_v26, %v1439_v58  ;;  %v1582_v22 = vperm.slane %v1225_v2, %v2426_v51  ;;  %v1319_v20 = vmul.f32 %v1225_v2, %v1225_v2 }
 0x421   : > { %v1625_v43 = vperm.slane %v1442_v55, %v2412_v30 }
 0x422   : > { %v1998_v50 = vpop.eup %1997  ;;  %v1583_v40 = vsel %vm3122_vm5, %v1582_v22, %v1581_v45 }
 0x423   : > { %v1444_v33 = vmul.f32 %v1998_v50, %v1350_v34  ;;  %v1626_v21 = vsel %vm783_vm6, %v1625_v43, %v1624_v35  ;;  %vm3123_vm6 = vcmask 654912  }
 0x424   : > { %vm3125_vm7 = vmmov %vm3123_vm6 }
 0x425   : > { %v1445_v29 = vmul.f32 %v1998_v50, %v1444_v33 }
 0x427   : > { %v1446_v38 = vmul.f32 0.5, %v1445_v29  ;;  %v1289_v46 = vpop.xlane.xlu1 %1288 }
 0x428   : > { %v1335_v11 = vsub.f32 %v1289_v46, %v1319_v20 }
 0x429   : > { %v1447_v8 = vsub.f32 1.5, %v1446_v38 }
 0x42a   : > { %v1351_v63 = vmax.f32 %v1335_v11, 1e-12 }
 0x42b   : > { %v1448_v6 = vmul.f32 %v1998_v50, %v1447_v8 }
 0x42c   : > { %1999 = vrsqrt.f32 %v1351_v63  ;;  %vm1462_vm14 = vcmp.eq.f32.partialorder %v1351_v63, inf  ;;  %v1465_v19 = vand.u32 2147483648, %v1351_v63  ;;  %vm1464_vm2 = vcmp.eq.f32.partialorder %v1351_v63, 0.0 }
 0x42d   : > { %v1449_v10 = vmul.f32 %v1448_v6, %v1350_v34 }
 0x42f   : > { %v1451_v28 = vsel %vm1450_vm3, %v1350_v34, %v1449_v10  ;;  %v1228_v30 = vpop.xlane.xlu1 %1227 }
 0x430   : > { %v1454_v7 = vsel %vm1452_vm8, %v1453_v16, %v1451_v28  ;;  %v1320_v25 = vmul.f32 %v1228_v30, %v1228_v30  ;;  %v1584_v15 = vperm.slane %v1228_v30, %v2443_v57 }
 0x431   : > { %v1627_v0 = vperm.slane %v1454_v7, %v2417_v41 }
 0x432   : > { %v2000_v9 = vpop.eup %1999  ;;  %v1585_v23 = vsel %vm3123_vm6, %v1584_v15, %v1583_v40  ;;  %v1336_v13 = vsub.f32 %v1292_v17, %v1320_v25 }
 0x433   : > { %v1456_v32 = vmul.f32 %v2000_v9, %v1351_v63  ;;  %v1628_v27 = vsel %vm787_vm12, %v1627_v0, %v1626_v21  ;;  %vm3124_vm12 = vmmov %vm3122_vm5 }
 0x434   : > { %v1352_v44 = vmax.f32 %v1336_v13, 1e-12 }
 0x435   : > { %v1457_v37 = vmul.f32 %v2000_v9, %v1456_v32 }
 0x436   : > { %2001 = vrsqrt.f32 %v1352_v44  ;;  %vm1474_vm11 = vcmp.eq.f32.partialorder %v1352_v44, inf  ;;  %v1477_v2 = vand.u32 2147483648, %v1352_v44  ;;  %vm1476_vm1 = vcmp.eq.f32.partialorder %v1352_v44, 0.0 }
 0x437   : > { %v1458_v3 = vmul.f32 0.5, %v1457_v37  ;;  %v1231_v36 = vpop.xlane.xlu1 %1230 }
 0x438   : > { %v1586_v14 = vperm.slane %v1231_v36, %v2464_v12  ;;  %v1321_v35 = vmul.f32 %v1231_v36, %v1231_v36 }
 0x439   : > { %v1459_v60 = vsub.f32 1.5, %v1458_v3 }
 0x43a   : > { %v1587_v53 = vsel %vm799_vm10, %v1586_v14, %v1585_v23 }
 0x43b   : > { %v1460_v48 = vmul.f32 %v2000_v9, %v1459_v60 }
 0x43c   : > { %v2002_v49 = vpop.eup %2001 }
 0x43d   : > { %v1461_v41 = vmul.f32 %v1460_v48, %v1351_v63  ;;  %v1468_v45 = vmul.f32 %v2002_v49, %v1352_v44 }
 0x43f   : > { %v1463_v5 = vsel %vm1462_vm14, %v1351_v63, %v1461_v41  ;;  %v1469_v59 = vmul.f32 %v2002_v49, %v1468_v45  ;;  %v1295_v56 = vpop.xlane.xlu1 %1294 }
 0x440   : > { %v1466_v52 = vsel %vm1464_vm2, %v1465_v19, %v1463_v5  ;;  %v1337_v18 = vsub.f32 %v1295_v56, %v1321_v35 }
 0x441   : > { %v1629_v62 = vperm.slane %v1466_v52, %v2426_v51  ;;  %v1470_v39 = vmul.f32 0.5, %v1469_v59 }
 0x442   : > { %v1353_v34 = vmax.f32 %v1337_v18, 1e-12 }
 0x443   : > { %v1471_v47 = vsub.f32 1.5, %v1470_v39  ;;  %v1630_v24 = vsel %vm3124_vm12, %v1629_v62, %v1628_v27 }
 0x444   : > { %2003 = vrsqrt.f32 %v1353_v34  ;;  %vm1486_vm4 = vcmp.eq.f32.partialorder %v1353_v34, inf  ;;  %v1489_v16 = vand.u32 2147483648, %v1353_v34  ;;  %vm1488_vm5 = vcmp.eq.f32.partialorder %v1353_v34, 0.0 }
 0x445   : > { %v1472_v31 = vmul.f32 %v2002_v49, %v1471_v47 }
 0x447   : > { %v1473_v26 = vmul.f32 %v1472_v31, %v1352_v44  ;;  %v1234_v58 = vpop.xlane.xlu1 %1233 }
 0x448   : > { %v1588_v55 = vperm.slane %v1234_v58, %v2498_v61  ;;  %v1322_v20 = vmul.f32 %v1234_v58, %v1234_v58 }
 0x449   : > { %v1475_v22 = vsel %vm1474_vm11, %v1352_v44, %v1473_v26 }
 0x44a   : > { %v2004_v43 = vpop.eup %2003  ;;  %v1478_v50 = vsel %vm1476_vm1, %v1477_v2, %v1475_v22  ;;  %v1589_v40 = vsel %vm803_vm13, %v1588_v55, %v1587_v53 }
 0x44b   : > { %v1480_v51 = vmul.f32 %v2004_v43, %v1353_v34  ;;  %v1631_v33 = vperm.slane %v1478_v50, %v2443_v57 }
 0x44d   : > { %v1481_v21 = vmul.f32 %v2004_v43, %v1480_v51  ;;  %v1632_v29 = vsel %vm3125_vm7, %v1631_v33, %v1630_v24  ;;  %vm3126_vm7 = vcmask 1048512  }
 0x44f   : > { %v1482_v38 = vmul.f32 0.5, %v1481_v21  ;;  %v1298_v46 = vpop.xlane.xlu1 %1297 }
 0x450   : > { %v1338_v11 = vsub.f32 %v1298_v46, %v1322_v20 }
 0x451   : > { %v1483_v8 = vsub.f32 1.5, %v1482_v38 }
 0x452   : > { %v1354_v63 = vmax.f32 %v1338_v11, 1e-12 }
 0x453   : > { %v1484_v6 = vmul.f32 %v2004_v43, %v1483_v8 }
 0x454   : > { %2005 = vrsqrt.f32 %v1354_v63  ;;  %vm1498_vm3 = vcmp.eq.f32.partialorder %v1354_v63, inf  ;;  %v1501_v3 = vand.u32 2147483648, %v1354_v63  ;;  %vm1500_vm8 = vcmp.eq.f32.partialorder %v1354_v63, 0.0 }
 0x455   : > { %v1485_v10 = vmul.f32 %v1484_v6, %v1353_v34 }
 0x457   : > { %v1487_v28 = vsel %vm1486_vm4, %v1353_v34, %v1485_v10  ;;  %v1237_v30 = vpop.xlane.xlu1 %1236  ;;  %vm1646_vm4 = vcmask 1040384  }
 0x458   : > { %v1590_v17 = vperm.slane %v1237_v30, %v2516_v1  ;;  %v1490_v57 = vsel %vm1488_vm5, %v1489_v16, %v1487_v28  ;;  %v1323_v45 = vmul.f32 %v1237_v30, %v1237_v30  ;;  %vm3128_vm5 = vmmov %vm3126_vm7 }
 0x459   : > { %v1633_v7 = vperm.slane %v1490_v57, %v2464_v12 }
 0x45a   : > { %v2006_v25 = vpop.eup %2005  ;;  %v1591_v15 = vsel %vm807_vm0, %v1590_v17, %v1589_v40 }
 0x45b   : > { %v1492_v0 = vmul.f32 %v2006_v25, %v1354_v63  ;;  %v1634_v9 = vsel %vm799_vm10, %v1633_v7, %v1632_v29 }
 0x45d   : > { %v1493_v23 = vmul.f32 %v2006_v25, %v1492_v0 }
 0x45f   : > { %v1494_v13 = vmul.f32 0.5, %v1493_v23  ;;  %v1301_v32 = vpop.xlane.xlu1 %1300 }
 0x460   : > { %v1339_v35 = vsub.f32 %v1301_v32, %v1323_v45 }
 0x461   : > { %v1495_v27 = vsub.f32 1.5, %v1494_v13 }
 0x462   : > { %v1355_v56 = vmax.f32 %v1339_v35, 1e-12 }
 0x463   : > { %v1496_v44 = vmul.f32 %v2006_v25, %v1495_v27 }
 0x464   : > { %2007 = vrsqrt.f32 %v1355_v56  ;;  %vm1510_vm10 = vcmp.eq.f32.partialorder %v1355_v56, inf  ;;  %v1513_v25 = vand.u32 2147483648, %v1355_v56  ;;  %vm1512_vm14 = vcmp.eq.f32.partialorder %v1355_v56, 0.0 }
 0x465   : > { %v1497_v37 = vmul.f32 %v1496_v44, %v1354_v63 }
 0x467   : > { %v1499_v36 = vsel %vm1498_vm3, %v1354_v63, %v1497_v37  ;;  %v1240_v14 = vpop.xlane.xlu1 %1239 }
 0x468   : > { %v1592_v60 = vperm.slane %v1240_v14, %v2542_v42  ;;  %v1502_v12 = vsel %vm1500_vm8, %v1501_v3, %v1499_v36  ;;  %v1324_v19 = vmul.f32 %v1240_v14, %v1240_v14 }
 0x469   : > { %v1635_v53 = vperm.slane %v1502_v12, %v2498_v61 }
 0x46a   : > { %v2996_v48 = vsel %vm811_vm15, %v1592_v60, %v1591_v15  ;;  %v2008_v34 = vpop.eup %2007 }
 0x46b   : > { %v2999_v49 = vsel %vm803_vm13, %v1635_v53, %v1634_v9  ;;  %v1504_v24 = vmul.f32 %v2008_v34, %v1355_v56 }
 0x46d   : > { %v1505_v2 = vmul.f32 %v2008_v34, %v1504_v24 }
 0x46f   : > { %v1304_v41 = vpop.xlane.xlu1 %1303  ;;  %v1506_v50 = vmul.f32 0.5, %v1505_v2 }
 0x470   : > { %v1340_v5 = vsub.f32 %v1304_v41, %v1324_v19 }
 0x471   : > { %v1507_v20 = vsub.f32 1.5, %v1506_v50 }
 0x472   : > { %v1356_v52 = vmax.f32 %v1340_v5, 1e-12 }
 0x473   : > { %v1508_v8 = vmul.f32 %v2008_v34, %v1507_v20 }
 0x474   : > { %2009 = vrsqrt.f32 %v1356_v52  ;;  %vm1522_vm13 = vcmp.eq.f32.partialorder %v1356_v52, inf  ;;  %v1525_v9 = vand.u32 2147483648, %v1356_v52  ;;  %vm1524_vm2 = vcmp.eq.f32.partialorder %v1356_v52, 0.0 }
 0x475   : > { %v1509_v16 = vmul.f32 %v1508_v8, %v1355_v56 }
 0x477   : > { %v3001_v59 = vpop.xlane.xlu1 %1242  ;;  %v1511_v7 = vsel %vm1510_vm10, %v1355_v56, %v1509_v16 }
 0x478   : > { %v1325_v61 = vmul.f32 %v3001_v59, %v3001_v59  ;;  %v1514_v13 = vsel %vm1512_vm14, %v1513_v25, %v1511_v7  ;;  %v1594_v45 = vperm.slane %v3001_v59, %v2575_v4 }
 0x479   : > { %v1637_v36 = vperm.slane %v1514_v13, %v2516_v1 }
 0x47a   : > { %v2010_v47 = vpop.eup %2009 }
 0x47b   : > { %v1516_v31 = vmul.f32 %v2010_v47, %v1356_v52  ;;  %v1638_v1 = vsel %vm807_vm0, %v1637_v36, %v2999_v49  ;;  %v1595_v49 = vsel %vm815_vm9, %v1594_v45, %v2996_v48 }
 0x47d   : > { %v1517_v55 = vmul.f32 %v2010_v47, %v1516_v31 }
 0x47f   : > { %v1307_v18 = vpop.xlane.xlu1 %1306  ;;  %v1518_v51 = vmul.f32 0.5, %v1517_v55 }
 0x480   : > { %v1341_v62 = vsub.f32 %v1307_v18, %v1325_v61 }
 0x481   : > { %v1519_v46 = vsub.f32 1.5, %v1518_v51 }
 0x482   : > { %v1357_v39 = vmax.f32 %v1341_v62, 1e-12 }
 0x483   : > { %v1520_v63 = vmul.f32 %v2010_v47, %v1519_v46 }
 0x484   : > { %2011 = vrsqrt.f32 %v1357_v39  ;;  %vm1534_vm6 = vcmp.eq.f32.partialorder %v1357_v39, inf  ;;  %v1537_v32 = vand.u32 2147483648, %v1357_v39  ;;  %vm1536_vm12 = vcmp.eq.f32.partialorder %v1357_v39, 0.0 }
 0x485   : > { %v1521_v28 = vmul.f32 %v1520_v63, %v1356_v52 }
 0x487   : > { %v3005_v26 = vpop.xlane.xlu1 %1245  ;;  %v1523_v15 = vsel %vm1522_vm13, %v1356_v52, %v1521_v28  ;;  %v3127_v52 = vlaneseq }
 0x488   : > { %v1326_v40 = vmul.f32 %v3005_v26, %v3005_v26  ;;  %v1526_v44 = vsel %vm1524_vm2, %v1525_v9, %v1523_v15 }
 0x489   : > { %v1639_v60 = vperm.slane %v1526_v44, %v2542_v42  ;;  %v1596_v42 = vperm.slane %v3005_v26, %v2585_v54  ;;  %vm1651_vm0 = vcmp.lt.s32.totalorder %v3127_v52, 256 }
 0x48a   : > { %v2012_v58 = vpop.eup %2011 }
 0x48b   : > { %v1528_v22 = vmul.f32 %v2012_v58, %v1357_v39  ;;  %v1640_v35 = vsel %vm811_vm15, %v1639_v60, %v1638_v1  ;;  %v1597_v61 = vsel %vm3128_vm5, %v1596_v42, %v1595_v49 }
 0x48d   : > { %v1529_v43 = vmul.f32 %v2012_v58, %v1528_v22 }
 0x48f   : > { %v1310_v33 = vpop.xlane.xlu1 %1309  ;;  %v1530_v21 = vmul.f32 0.5, %v1529_v43 }
 0x490   : > { %v1342_v29 = vsub.f32 %v1310_v33, %v1326_v40 }
 0x491   : > { %v1531_v11 = vsub.f32 1.5, %v1530_v21 }
 0x492   : > { %v1358_v38 = vmax.f32 %v1342_v29, 1e-12 }
 0x493   : > { %v1532_v6 = vmul.f32 %v2012_v58, %v1531_v11 }
 0x494   : > { %2013 = vrsqrt.f32 %v1358_v38  ;;  %vm1546_vm11 = vcmp.eq.f32.partialorder %v1358_v38, inf  ;;  %v1549_v12 = vand.u32 2147483648, %v1358_v38  ;;  %vm1548_vm1 = vcmp.eq.f32.partialorder %v1358_v38, 0.0 }
 0x495   : > { %v1533_v17 = vmul.f32 %v1532_v6, %v1357_v39 }
 0x497   : > { %v1535_v23 = vsel %vm1534_vm6, %v1357_v39, %v1533_v17 }
 0x498   : > { %v1538_v37 = vsel %vm1536_vm12, %v1537_v32, %v1535_v23 }
 0x499   : > { %v1641_v53 = vperm.slane %v1538_v37, %v2575_v4 }
 0x49a   : > { %v2014_v10 = vpop.eup %2013 }
 0x49b   : > { %v1540_v30 = vmul.f32 %v2014_v10, %v1358_v38  ;;  %v1642_v56 = vsel %vm815_vm9, %v1641_v53, %v1640_v35 }
 0x49d   : > { %v1541_v57 = vmul.f32 %v2014_v10, %v1540_v30 }
 0x49f   : > { %v1542_v0 = vmul.f32 0.5, %v1541_v57 }
 0x4a1   : > { %v1543_v27 = vsub.f32 1.5, %v1542_v0 }
 0x4a3   : > { %v1544_v3 = vmul.f32 %v2014_v10, %v1543_v27 }
 0x4a5   : > { %v1545_v14 = vmul.f32 %v1544_v3, %v1358_v38 }
 0x4a7   : > { %v1547_v41 = vsel %vm1546_vm11, %v1358_v38, %v1545_v14 }
 0x4a8   : > { %v1550_v19 = vsel %vm1548_vm1, %v1549_v12, %v1547_v41 }
 0x4a9   : > { %v1643_v5 = vperm.slane %v1550_v19, %v2585_v54 }
 0x4ab   : > { %v1644_v4 = vsel %vm3126_vm7, %v1643_v5, %v1642_v56 }
 0x4ac   : > { %v1645_v59 = vrot.slane %v1644_v4, 7 }
 0x4ae   : > { %v1647_v54 = vsel %vm1646_vm4, %v1597_v61, %v1645_v59 }
 0x4af   : > { %1653 = vst.msk [vmem:[%s217_s22] sm:$0x3] %vm1651_vm0, %v1647_v54 }
 0x4b0   : > { %2058 = shalt.err (!%p2055_p3)
}
 0x4b1   : > { %1901 = dma.vmem_to_hbm [thread:$0]  (%p2163_p5), %s1668_s30, 32, %s1670_s6, %s1655_s7  }
 0x4b2 PF: > { %p1907_p4 = scmp.ge.s32.totalorder %s2093_s21, 2  ;;  %s1681_s9 = sand.u32 1, %s2081_s18  }
 0x4b3   : > { %s1682_s16 = scalar_lea.sflag [#allocation3], %s1681_s9 }
 0x4b4   : > { %p1904_p7 = pnand %p1907_p4, %p2167_p6 }
 0x4b6   : > { %p1905_p8 = pneg %p1904_p7 }
 0x4b8   : > { %2076 = dma.done.wait (%p1905_p8), %s1682_s16, 32  }
 0x4b9   : > { %2078 = vsyncadd (%p1905_p8), %s1682_s16, 4294967264  ;;  %p15_p9 = scmp.ge.s32.totalorder %s2150_s24, 4   ;;  %s3129_s18 = smov %s2085_s19 }
 0x4ba   : > { %s3130_s19 = smov %s2089_s20  ;;  %s3131_s20 = smov %s2161_s27 }
 0x4bb   : > { %s3132_s21 = smov %s2150_s24  ;;  %17 = sbr.rel (!%p15_p9) target bundleno = 3 (0x3), region = 75 }
 0x4c0   :  { %1688 = vsyncpa [#allocation3], 1 }
 0x4c1   :  { %1690 = vsyncpa [#allocation3 + $0x1], 1 }

</bundles_post_ra>
